<compile_context>
chip_gen: v5e
topology: v5e:2x2
jax: 0.10.0
libtpu: 0.0.40
codegen_flags: <defaults>
</compile_context>

<pallas_src>
import functools

import numpy as np
import jax
import jax.numpy as jnp
from jax.experimental import pallas as pl
from jax.experimental.pallas import tpu as pltpu

# ----------------------- configuration (small, demo-sized) -----------------------
K = 3               # sample_size
NF = 32             # nf
SCALE = 2           # scale
STAGES = 2          # stages
NUM_SAMPLERS = 2    # num_samplers

K2 = K * K
KB = 2 * K - 1                 # side of the rotation-shared "big" window (5)
K2B = KB * KB                  # 25
K2B_PAD = 32                   # padded big-patch dim (multiple of 8)
BR = 4 * NUM_SAMPLERS          # branches per stage = rotations x samplers (8)
HID = BR * NF                  # stacked hidden width (256)
TM_MAX = 2048                  # pixel (lane) tile upper bound
PATCH_DTYPE = jnp.bfloat16     # HBM/DMA dtype for the streamed patch matrix
WEIGHT_DTYPE = jnp.bfloat16    # resident MXU weight dtype
VMEM_LIMIT = 32 * 1024 * 1024  # explicit scoped-VMEM limit (< v7x's 64 MiB)


# ----------------------------- the Pallas kernel ---------------------------------
def _stage_kernel(p_ref, w1_ref, b1_ref, w2_ref, b2_ref, wo_ref, bo_ref, o_ref,
                  *, out_c, mode):
    # p_ref: (D_in, TM) bf16 patches, pixels on the 128-lane axis.
    x = p_ref[...]                                                  # bf16
    # Fused AutoSample + MuLUT layer 1 for all 8 branches at once
    # (bf16 x bf16 single-pass MXU, f32 accumulation).
    h = jnp.dot(w1_ref[...], x, preferred_element_type=jnp.float32) + b1_ref[...]
    h = jnp.maximum(h, 0.0).astype(jnp.bfloat16)                    # (HID, TM)
    # Block-diagonal dense 1x1 layer (per-branch w2).
    h = jnp.dot(w2_ref[...], h, preferred_element_type=jnp.float32) + b2_ref[...]
    h = jnp.maximum(h, 0.0).astype(jnp.bfloat16)                    # (HID, TM)
    # Per-branch output head; rotate-back folded into the channel order.
    z = jnp.dot(wo_ref[...], h, preferred_element_type=jnp.float32) + bo_ref[...]
    q = jnp.round(jnp.tanh(z) * 127.0)                              # (out_c*BR, TM)
    # Rotation-ensemble + sampler sum: rows are channel-major (c*BR + b), so
    # each channel's 8 branches form one aligned 8-sublane group reduce.
    acc = q.reshape(out_c, BR, q.shape[-1]).sum(axis=1)             # (out_c, TM)
    # Inter-stage epilogue fused into the final write (emits next stage input).
    if mode == 'mid':
        out = jnp.round(jnp.clip(acc * (1.0 / (NUM_SAMPLERS * 4)) + 127.0,
                                 0.0, 255.0)) * (1.0 / 255.0)
    elif mode == 'last_train':
        out = jnp.round(acc * (1.0 / NUM_SAMPLERS)) * (1.0 / 255.0)
    else:  # 'last_test'
        out = jnp.round(acc * (1.0 / NUM_SAMPLERS))
    o_ref[...] = out


def _stage_pallas(pt, w1t, b1, w2t, b2, wot, bo, out_c, tm, mode):
    """pt: (D_in, N_pad) bf16 -> (out_c, N_pad) f32 stage output (epilogue fused)."""
    d_in, n_pad = pt.shape
    hid = w1t.shape[0]
    o_stack = wot.shape[0]
    return pl.pallas_call(
        functools.partial(_stage_kernel, out_c=out_c, mode=mode),
        out_shape=jax.ShapeDtypeStruct((out_c, n_pad), jnp.float32),
        grid_spec=pltpu.PrefetchScalarGridSpec(
            num_scalar_prefetch=0,
            grid=(n_pad // tm,),
            in_specs=[
                pl.BlockSpec((d_in, tm), lambda i: (0, i)),     # streamed patches
                pl.BlockSpec((hid, d_in), lambda i: (0, 0)),    # resident weights
                pl.BlockSpec((hid, 1), lambda i: (0, 0)),
                pl.BlockSpec((hid, hid), lambda i: (0, 0)),
                pl.BlockSpec((hid, 1), lambda i: (0, 0)),
                pl.BlockSpec((o_stack, hid), lambda i: (0, 0)),
                pl.BlockSpec((o_stack, 1), lambda i: (0, 0)),
            ],
            out_specs=pl.BlockSpec((out_c, tm), lambda i: (0, i)),
        ),
        compiler_params=pltpu.CompilerParams(
            dimension_semantics=("parallel",),
            vmem_limit_bytes=VMEM_LIMIT),
    )(pt, w1t, b1, w2t, b2, wot, bo)


# ------------------------ rotation-as-permutation tables --------------------------
def _rot_colmap(r):
    """Big-window column index feeding network patch slot (dy, dx) under rotation r."""
    idx = []
    for dy in range(K):
        for dx in range(K):
            if r == 0:
                u, v = dy, dx
            elif r == 1:
                u, v = dx, -dy
            elif r == 2:
                u, v = -dy, -dx
            else:
                u, v = -dx, dy
            idx.append((u + K - 1) * KB + (v + K - 1))
    return np.asarray(idx, np.int32)


def _rot_outperm(r, up):
    """Final sub-pixel channel for net output channel c = py*up + px under rotation r."""
    perm = []
    for py in range(up):
        for px in range(up):
            if r == 0:
                sy, sx = py, px
            elif r == 1:
                sy, sx = px, up - 1 - py
            elif r == 2:
                sy, sx = up - 1 - py, up - 1 - px
            else:
                sy, sx = up - 1 - px, py
            perm.append(sy * up + sx)
    return perm


# --------------------------- per-stage weight stacking ----------------------------
def build_stage_weights(params, stage):
    p0 = params[(stage, 0)]
    up = p0['upscale']
    out_c = up * up
    residual = p0['res_w'] is not None
    d_in = 2 * K2B_PAD if residual else K2B_PAD
    o_stack = out_c * BR

    w1 = jnp.zeros((d_in, HID), jnp.float32)
    b1 = jnp.zeros((HID,), jnp.float32)
    w2 = jnp.zeros((HID, HID), jnp.float32)
    b2 = jnp.zeros((HID,), jnp.float32)
    wo = jnp.zeros((HID, o_stack), jnp.float32)
    bo = jnp.zeros((o_stack,), jnp.float32)

    for i in range(NUM_SAMPLERS):
        p = params[(stage, i)]
        w1f = p['ws'] @ p['w1']                 # AutoSample folded into layer 1
        alpha = jax.nn.sigmoid(p['res_w']) if residual else None
        for r in range(4):
            b = i * 4 + r
            cm = _rot_colmap(r)
            if residual:                        # AdaRL mix folded into layer 1
                w1 = w1.at[cm, b * NF:(b + 1) * NF].set(alpha * w1f)
                w1 = w1.at[K2B_PAD + cm, b * NF:(b + 1) * NF].set((1.0 - alpha) * w1f)
            else:
                w1 = w1.at[cm, b * NF:(b + 1) * NF].set(w1f)
            b1 = b1.at[b * NF:(b + 1) * NF].set(p['b1'])
            w2 = w2.at[b * NF:(b + 1) * NF, b * NF:(b + 1) * NF].set(p['w2'])
            b2 = b2.at[b * NF:(b + 1) * NF].set(p['b2'])
            operm = _rot_outperm(r, up)
            for c in range(out_c):
                col = operm[c] * BR + b         # channel-major -> aligned 8-row reduce
                wo = wo.at[b * NF:(b + 1) * NF, col].set(p['wo'][:, c])
                bo = bo.at[col].set(p['bo'][c])

    # Weights go to the MXU in bf16 (f32 accumulation); biases stay f32.
    return dict(w1t=w1.T.astype(WEIGHT_DTYPE), b1=b1.reshape(-1, 1),
                w2t=w2.T.astype(WEIGHT_DTYPE), b2=b2.reshape(-1, 1),
                wot=wo.T.astype(WEIGHT_DTYPE), bo=bo.reshape(-1, 1),
                up=up, out_c=out_c, residual=residual)


# --------------------------------- JAX glue ---------------------------------------
def _im2col_big(x):
    """x: (B,1,H,W) -> (K2B, B*H*W) bf16 big-window patch matrix (pixels minor)."""
    b, _, h, w = x.shape
    xp = jnp.pad(x, ((0, 0), (0, 0), (K - 1, K - 1), (K - 1, K - 1)),
                 mode='edge').astype(PATCH_DTYPE)
    cols = [xp[:, 0, u:u + h, v:v + w] for u in range(KB) for v in range(KB)]
    return jnp.stack(cols, axis=0).reshape(K2B, b * h * w)


def _pick_tm(n):
    n128 = -(-n // 128) * 128
    if n128 > TM_MAX:
        return TM_MAX
    if n128 >= 256:
        # v7x megacore: keep the 1-D "parallel" grid at >= 2 steps when possible.
        return -(-(n128 // 2) // 128) * 128
    return n128


def stage_pred(x, last_x, sw, mode):
    """One stage: branch-summed quantized SRNet outputs + fused stage epilogue."""
    b, _, h, w = x.shape
    n = b * h * w
    pt = jnp.pad(_im2col_big(x), ((0, K2B_PAD - K2B), (0, 0)))
    if sw['residual']:
        lt = jnp.pad(_im2col_big(last_x), ((0, K2B_PAD - K2B), (0, 0)))
        pt = jnp.concatenate([pt, lt], axis=0)
    tm = _pick_tm(n)
    n_pad = -(-n // tm) * tm
    pt = jnp.pad(pt, ((0, 0), (0, n_pad - n)))

    out = _stage_pallas(pt, sw['w1t'], sw['b1'], sw['w2t'], sw['b2'],
                        sw['wot'], sw['bo'], sw['out_c'], tm, mode)[:, :n]

    # pixel shuffle: channel (sy, sx) -> spatial offset (sy, sx) at each anchor.
    up = sw['up']
    out = out.reshape(up, up, b, h, w).transpose(2, 3, 0, 4, 1)
    return out.reshape(b, 1, h * up, w * up)


def srnets_forward(x, params, phase='train'):
    stage_weights = [build_stage_weights(params, s) for s in range(STAGES)]
    last_x = None
    for stage in range(STAGES):
        last = stage + 1 == STAGES
        mode = ('last_train' if phase == 'train' else 'last_test') if last else 'mid'
        new_x = stage_pred(x, last_x, stage_weights[stage], mode)
        last_x = x
        x = new_x
    return x


# ------------------------------ deterministic params -------------------------------
def init_params(key):
    params = {}
    for s in range(STAGES):
        up = SCALE if s + 1 == STAGES else 1
        out = up * up
        for i in range(NUM_SAMPLERS):
            key, k0, k1, k2, k3, k4 = jax.random.split(key, 6)
            params[(s, i)] = dict(
                ws=jax.random.normal(k0, (K2, 4), jnp.float32) * 0.3,
                w1=jax.random.normal(k1, (4, NF), jnp.float32) * 0.5,
                b1=jnp.zeros((NF,), jnp.float32),
                w2=jax.random.normal(k2, (NF, NF), jnp.float32) / jnp.sqrt(float(NF)),
                b2=jnp.zeros((NF,), jnp.float32),
                wo=jax.random.normal(k3, (NF, out), jnp.float32) / jnp.sqrt(float(NF)),
                bo=jnp.zeros((out,), jnp.float32),
                res_w=(jax.random.normal(k4, (), jnp.float32) * 0.1
                       if s + 1 > 1 else None),
                upscale=up)
    return params


# --------------------------------------- main --------------------------------------
if __name__ == "__main__":
    key = jax.random.PRNGKey(0)
    kx, kp = jax.random.split(key)
    B, C, H, W = 2, 1, 16, 16
    x = jax.random.uniform(kx, (B, C, H, W), jnp.float32)   # normalized image in [0,1]
    params = init_params(kp)

    y = srnets_forward(x, params, phase='train')
    y = jax.block_until_ready(y)

    assert y.shape == (B, 1, H * SCALE, W * SCALE), y.shape
    assert y.dtype == jnp.float32
    assert bool(jnp.all(jnp.isfinite(y)))
    print("KERNEL_OK")
</pallas_src>

<mosaic_0001>
module attributes {stable_mosaic.version = 11 : i64} {
  func.func @_stage_kernel(%arg0: i32, %arg1: memref<32x256xbf16, #tpu.memory_space<vmem>>, %arg2: memref<256x32xbf16, #tpu.memory_space<vmem>>, %arg3: memref<256x1xf32, #tpu.memory_space<vmem>>, %arg4: memref<256x256xbf16, #tpu.memory_space<vmem>>, %arg5: memref<256x1xf32, #tpu.memory_space<vmem>>, %arg6: memref<8x256xbf16, #tpu.memory_space<vmem>>, %arg7: memref<8x1xf32, #tpu.memory_space<vmem>>, %arg8: memref<1x256xf32, #tpu.memory_space<vmem>>) attributes {dimension_semantics = [#tpu.dimension_semantics<parallel>], iteration_bounds = array<i64: 2>, scalar_prefetch = 0 : i64, scratch_operands = 0 : i64, tpu.core_type = #tpu.core_type<tc>, window_params = [{transform_indices = @transform_0, window_bounds = array<i64: 32, 256>}, {pipeline_mode = #tpu.pipeline_mode<synchronous>, transform_indices = @transform_1, window_bounds = array<i64: 256, 32>}, {pipeline_mode = #tpu.pipeline_mode<synchronous>, transform_indices = @transform_2, window_bounds = array<i64: 256, 1>}, {pipeline_mode = #tpu.pipeline_mode<synchronous>, transform_indices = @transform_3, window_bounds = array<i64: 256, 256>}, {pipeline_mode = #tpu.pipeline_mode<synchronous>, transform_indices = @transform_4, window_bounds = array<i64: 256, 1>}, {pipeline_mode = #tpu.pipeline_mode<synchronous>, transform_indices = @transform_5, window_bounds = array<i64: 8, 256>}, {pipeline_mode = #tpu.pipeline_mode<synchronous>, transform_indices = @transform_6, window_bounds = array<i64: 8, 1>}, {transform_indices = @transform_7, window_bounds = array<i64: 1, 256>}]} {
    %c0 = arith.constant 0 : index
    %c0_0 = arith.constant 0 : index
    %0 = vector.load %arg1[%c0, %c0_0] : memref<32x256xbf16, #tpu.memory_space<vmem>>, vector<32x256xbf16>
    %c0_1 = arith.constant 0 : index
    %c0_2 = arith.constant 0 : index
    %1 = vector.load %arg2[%c0_1, %c0_2] : memref<256x32xbf16, #tpu.memory_space<vmem>>, vector<256x32xbf16>
    %cst = arith.constant dense<0.000000e+00> : vector<256x256xf32>
    %2 = tpu.matmul %1, %0, %cst {dimension_numbers = #tpu.dot_dimension_numbers<[1], [0], [0], [1], [0, 0, 1, 1], [], []>} : vector<256x32xbf16>, vector<32x256xbf16>, vector<256x256xf32> -> vector<256x256xf32>
    %c0_3 = arith.constant 0 : index
    %c0_4 = arith.constant 0 : index
    %3 = vector.load %arg3[%c0_3, %c0_4] : memref<256x1xf32, #tpu.memory_space<vmem>>, vector<256x1xf32>
    %4 = vector.broadcast %3 : vector<256x1xf32> to vector<256x256xf32>
    %5 = arith.addf %2, %4 : vector<256x256xf32>
    %cst_5 = arith.constant 0.000000e+00 : f32
    %6 = vector.broadcast %cst_5 : f32 to vector<256x256xf32>
    %7 = arith.maximumf %5, %6 : vector<256x256xf32>
    %8 = arith.truncf %7 : vector<256x256xf32> to vector<256x256xbf16>
    %c0_6 = arith.constant 0 : index
    %c0_7 = arith.constant 0 : index
    %9 = vector.load %arg4[%c0_6, %c0_7] : memref<256x256xbf16, #tpu.memory_space<vmem>>, vector<256x256xbf16>
    %cst_8 = arith.constant dense<0.000000e+00> : vector<256x256xf32>
    %10 = tpu.matmul %9, %8, %cst_8 {dimension_numbers = #tpu.dot_dimension_numbers<[1], [0], [0], [1], [0, 0, 1, 1], [], []>} : vector<256x256xbf16>, vector<256x256xbf16>, vector<256x256xf32> -> vector<256x256xf32>
    %c0_9 = arith.constant 0 : index
    %c0_10 = arith.constant 0 : index
    %11 = vector.load %arg5[%c0_9, %c0_10] : memref<256x1xf32, #tpu.memory_space<vmem>>, vector<256x1xf32>
    %12 = vector.broadcast %11 : vector<256x1xf32> to vector<256x256xf32>
    %13 = arith.addf %10, %12 : vector<256x256xf32>
    %cst_11 = arith.constant 0.000000e+00 : f32
    %14 = vector.broadcast %cst_11 : f32 to vector<256x256xf32>
    %15 = arith.maximumf %13, %14 : vector<256x256xf32>
    %16 = arith.truncf %15 : vector<256x256xf32> to vector<256x256xbf16>
    %c0_12 = arith.constant 0 : index
    %c0_13 = arith.constant 0 : index
    %17 = vector.load %arg6[%c0_12, %c0_13] : memref<8x256xbf16, #tpu.memory_space<vmem>>, vector<8x256xbf16>
    %cst_14 = arith.constant dense<0.000000e+00> : vector<8x256xf32>
    %18 = tpu.matmul %17, %16, %cst_14 {dimension_numbers = #tpu.dot_dimension_numbers<[1], [0], [0], [1], [0, 0, 1, 1], [], []>} : vector<8x256xbf16>, vector<256x256xbf16>, vector<8x256xf32> -> vector<8x256xf32>
    %c0_15 = arith.constant 0 : index
    %c0_16 = arith.constant 0 : index
    %19 = vector.load %arg7[%c0_15, %c0_16] : memref<8x1xf32, #tpu.memory_space<vmem>>, vector<8x1xf32>
    %20 = vector.broadcast %19 : vector<8x1xf32> to vector<8x256xf32>
    %21 = arith.addf %18, %20 : vector<8x256xf32>
    %22 = math.tanh %21 : vector<8x256xf32>
    %cst_17 = arith.constant 1.270000e+02 : f32
    %23 = vector.broadcast %cst_17 : f32 to vector<8x256xf32>
    %24 = arith.mulf %22, %23 : vector<8x256xf32>
    %25 = math.roundeven %24 : vector<8x256xf32>
    %26 = vector.shape_cast %25 : vector<8x256xf32> to vector<1x8x256xf32>
    %cst_18 = arith.constant dense<0.000000e+00> : vector<1x256xf32>
    %27 = vector.multi_reduction <add>, %26, %cst_18 [1] : vector<1x8x256xf32> to vector<1x256xf32>
    %cst_19 = arith.constant 1.250000e-01 : f32
    %28 = vector.broadcast %cst_19 : f32 to vector<1x256xf32>
    %29 = arith.mulf %27, %28 : vector<1x256xf32>
    %cst_20 = arith.constant 1.270000e+02 : f32
    %30 = vector.broadcast %cst_20 : f32 to vector<1x256xf32>
    %31 = arith.addf %29, %30 : vector<1x256xf32>
    %cst_21 = arith.constant 0.000000e+00 : f32
    %cst_22 = arith.constant 2.550000e+02 : f32
    %32 = vector.broadcast %cst_21 : f32 to vector<1x256xf32>
    %33 = arith.maximumf %32, %31 : vector<1x256xf32>
    %34 = vector.broadcast %cst_22 : f32 to vector<1x256xf32>
    %35 = arith.minimumf %34, %33 : vector<1x256xf32>
    %36 = math.roundeven %35 : vector<1x256xf32>
    %cst_23 = arith.constant 0.00392156886 : f32
    %37 = vector.broadcast %cst_23 : f32 to vector<1x256xf32>
    %38 = arith.mulf %36, %37 : vector<1x256xf32>
    %c0_24 = arith.constant 0 : index
    %c0_25 = arith.constant 0 : index
    %39 = vector.load %arg8[%c0_24, %c0_25] : memref<1x256xf32, #tpu.memory_space<vmem>>, vector<1x256xf32>
    tpu.vector_store %arg8[%c0_24, %c0_25], %38 {strides = array<i32>} : memref<1x256xf32, #tpu.memory_space<vmem>>, vector<1x256xf32>,
    return
  }
  func.func @transform_0(%arg0: i32) -> (i32, i32) {
    %c0_i32 = arith.constant 0 : i32
    %c0_i32_0 = arith.constant 0 : i32
    return %c0_i32, %arg0 : i32, i32
  }
  func.func @transform_1(%arg0: i32) -> (i32, i32) {
    %c0_i32 = arith.constant 0 : i32
    %c0_i32_0 = arith.constant 0 : i32
    %c0_i32_1 = arith.constant 0 : i32
    return %c0_i32, %c0_i32_0 : i32, i32
  }
  func.func @transform_2(%arg0: i32) -> (i32, i32) {
    %c0_i32 = arith.constant 0 : i32
    %c0_i32_0 = arith.constant 0 : i32
    %c0_i32_1 = arith.constant 0 : i32
    return %c0_i32, %c0_i32_0 : i32, i32
  }
  func.func @transform_3(%arg0: i32) -> (i32, i32) {
    %c0_i32 = arith.constant 0 : i32
    %c0_i32_0 = arith.constant 0 : i32
    %c0_i32_1 = arith.constant 0 : i32
    return %c0_i32, %c0_i32_0 : i32, i32
  }
  func.func @transform_4(%arg0: i32) -> (i32, i32) {
    %c0_i32 = arith.constant 0 : i32
    %c0_i32_0 = arith.constant 0 : i32
    %c0_i32_1 = arith.constant 0 : i32
    return %c0_i32, %c0_i32_0 : i32, i32
  }
  func.func @transform_5(%arg0: i32) -> (i32, i32) {
    %c0_i32 = arith.constant 0 : i32
    %c0_i32_0 = arith.constant 0 : i32
    %c0_i32_1 = arith.constant 0 : i32
    return %c0_i32, %c0_i32_0 : i32, i32
  }
  func.func @transform_6(%arg0: i32) -> (i32, i32) {
    %c0_i32 = arith.constant 0 : i32
    %c0_i32_0 = arith.constant 0 : i32
    %c0_i32_1 = arith.constant 0 : i32
    return %c0_i32, %c0_i32_0 : i32, i32
  }
  func.func @transform_7(%arg0: i32) -> (i32, i32) {
    %c0_i32 = arith.constant 0 : i32
    %c0_i32_0 = arith.constant 0 : i32
    return %c0_i32, %arg0 : i32, i32
  }
}

</mosaic_0001>

<bundles_post_ra>
// kernel: tpu_custom_call.1
= control target key start
LH: loop header
LB: loop body
LE: loop exit
PB: predicated region body
PF: predicated region fallthrough
CT: control target
= control target key end

     0   :  { %12 = vsyncpa [#allocation4], 0  ;;  %s3457_s0 = inlined_call_operand.vmem [shape: bf16[32,512], index: 0, kind: input, shape index: {}]   ;;  %s3458_s1 = inlined_call_operand.vmem [shape: bf16[256,32], index: 1, kind: input, shape index: {}]   ;;  %s3459_s2 = inlined_call_operand.vmem [shape: f32[256,1], index: 2, kind: input, shape index: {}]   ;;  %s3460_s3 = inlined_call_operand.vmem [shape: bf16[256,256], index: 3, kind: input, shape index: {}]   ;;  %s3461_s4 = inlined_call_operand.vmem [shape: f32[256,1], index: 4, kind: input, shape index: {}]   ;;  %s3462_s5 = inlined_call_operand.vmem [shape: bf16[8,256], index: 5, kind: input, shape index: {}]   ;;  %s3463_s6 = inlined_call_operand.vmem [shape: f32[8,1], index: 6, kind: input, shape index: {}]   ;;  %s3464_s7 = inlined_call_operand.hbm [shape: f32[1,512], index: 7, kind: output, shape index: {}]  }
   0x1   :  { %14 = vsyncpa [#allocation4 + $0x1], 0  ;;  %s2497_s24 = smov 0   ;;  %s2499_s25 = smov 0  }
   0x2   :  { %s2501_s26 = smov 0   ;;  %s2503_s27 = smov 0  }
   0x3 LB: > { %s2002_s28 = sadd.s32 4294967295, %s2454_s27   ;;  %s2003_s29 = sadd.s32 4294967294, %s2454_s27   ;;  %s2454_s27 = sphi %s2503_s27, %s3536_s27   ;;  %s2450_s26 = sphi %s2501_s26, %s3535_s26   ;;  %s2446_s25 = sphi %s2499_s25, %s3534_s25   ;;  %s2442_s24 = sphi %s2497_s24, %s3533_s24  }
   0x4   : > { %s2520_s30 = sadd.s32 1, %s2454_s27   ;;  %s27_s8 = sadd.s32 1, %s2450_s26 }
   0x5   : > { %s24_s9 = ssub.s32 %s2454_s27, %s2520_s30  ;;  %p34_p0 = scmp.ne.s32.totalorder %s2450_s26, %s2446_s25 }
   0x6   : > { %p25_p1 = scmp.eq.s32.totalorder %s24_s9, 0  ;;  %p35_p2 = scmp.eq.s32.totalorder %s2454_s27, 0 }
   0x7   : > { %p190_p3 = scmp.eq.s32.totalorder %s2002_s28, 1  ;;  %p195_p4 = scmp.ne.s32.totalorder %s2446_s25, %s2442_s24 }
   0x8   : > { %s2533_s10 = scalar_select %p25_p1, %s2450_s26, %s27_s8  }
   0x9   : > { %p36_p5 = por %p35_p2, %p34_p0  ;;  %p2535_p6 = por %p190_p3, %p34_p0 }
   0xa   : > { %p196_p7 = scmp.eq.s32.totalorder %s2003_s29, 1  ;;  %p2005_p9 = scmp.ge.s32.totalorder %s2454_s27, 2 }
   0xc   : > { %p2539_p8 = por %p196_p7, %p195_p4  ;;  %230 = sbr.rel (%p2005_p9) target bundleno = 25 (0x19), region = 40 }
  0x11   : > { %233 = sbr.rel (!%p36_p5) target bundleno = 25 (0x19), region = 44  ;;  %s235_s13 = sand.u32 (%p36_p5), 1, %s2450_s26  }
  0x12   : > { %s2256_s14 = sshll.u32 (%p36_p5), %s2454_s27, 3  ;;  %s2006_s15 = sshll.u32 (%p36_p5), %s235_s13, 5 }
  0x13   : > { %s240_s18 = scalar_lea.vmem (%p36_p5), %s3457_s0, %s2256_s14  ;;  %s237_s19 = scalar_lea.vmem (%p36_p5), [#allocation2], %s2006_s15 }
  0x14   : > { %v275_v0 = vld [vmem:[%s240_s18] sm:$0xff] (%p36_p5)  ;;  %v277_v1 = vld [vmem:[%s240_s18 + $0x10] sm:$0xff] (%p36_p5) }
  0x15   : > { %v279_v2 = vld [vmem:[%s240_s18 + $0x20] sm:$0xff] (%p36_p5)  ;;  %276 = vst [vmem:[%s237_s19] sm:$0xff] (%p36_p5), %v275_v0  ;;  %v281_v3 = vld [vmem:[%s240_s18 + $0x30] sm:$0xff] (%p36_p5) }
  0x16   : > { %278 = vst [vmem:[%s237_s19 + $0x8] sm:$0xff] %v277_v1 }
  0x17   : > { %280 = vst [vmem:[%s237_s19 + $0x10] sm:$0xff] %v279_v2 }
  0x18   : > { %282 = vst [vmem:[%s237_s19 + $0x18] sm:$0xff] %v281_v3 }
  0x19 PF: > { %p2009_p10 = scmp.ge.s32.totalorder %s2454_s27, 1  ;;  %p287_p11 = scmp.lt.s32.totalorder %s2454_s27, 3 }
  0x1b   : > { %p288_p12 = pnand %p2009_p10, %p287_p11 }
  0x1d   : > { %291 = sbr.rel (%p288_p12) target bundleno = 976 (0x3d0), region = 82 }
  0x22   : > { %v394_v4 = vld [vmem:[%s3459_s2 + $0xf0] sm:$0xff]  ;;  %v376_v6 = vld [vmem:[%s3459_s2 + $0x60] sm:$0xff]  ;;  %s2563_s9 = sand.u32 1, %s2446_s25   ;;  %v2456_v7 = vmov 0   ;;  %v395_v19 = vld [vmem:[%s3459_s2 + $0xf8] sm:$0xff]  ;;  %vm656_vm0 = vcmask 261120  }
  0x23   : > { %v378_v5 = vld [vmem:[%s3459_s2 + $0x70] sm:$0xff]  ;;  %2387 = vset.pattern.permute.xlu2 %v2456_v7  ;;  %2386 = vset.pattern.permute.xlu1 %v2456_v7  ;;  %s2010_s13 = sshll.u32 %s2563_s9, 5  ;;  %v379_v20 = vld [vmem:[%s3459_s2 + $0x78] sm:$0xff]  ;;  %v377_v21 = vld [vmem:[%s3459_s2 + $0x68] sm:$0xff]  ;;  %s2011_s15 = sshll.u32 %s2563_s9, 1  ;;  %vm1914_vm5 = vcmask 1040384  }
  0x24   : > { %2385 = vset.pattern.permute.xlu0 %v2456_v7  ;;  %548 = vperm.xlu1 %2386, %v394_v4   ;;  %s296_s14 = scalar_lea.vmem [#allocation2], %s2010_s13  ;;  %v2261_v23 = vld [vmem:[%s3458_s1] sm:$0xff]  ;;  %v2271_v24 = vld [vmem:[%s3458_s1 + $0x50] sm:$0xff]  ;;  %v393_v25 = vld [vmem:[%s3459_s2 + $0xe8] sm:$0xff]  ;;  %s2253_s16 = sshll.u32 %s2002_s28, 1 }
  0x25   : > { %468 = vperm.xlu0 %2385, %v378_v5   ;;  %458 = vperm.xlu2 %2387, %v376_v6   ;;  %v2086_v8 = vld [vmem:[%s296_s14 + $0x10] sm:$0xf]  ;;  %v2260_v9 = vld [vmem:[%s296_s14 + $0x14] sm:$0xf0]  ;;  %v2259_v10 = vld [vmem:[%s296_s14 + $0x14] sm:$0xf]  ;;  %s1933_s19 = scalar_lea.hbm %s3464_s7, %s2253_s16 }
  0x26   : > { %v2087_v11 = vor.u32 %v2260_v9, %v2086_v8  ;;  %v2088_v12 = vld [vmem:[%s296_s14 + $0x18] sm:$0xf0]  ;;  %v2078_v13 = vld [vmem:[%s296_s14] sm:$0xf]  ;;  %v2258_v14 = vld [vmem:[%s296_s14 + $0x4] sm:$0xf0] }
  0x27   : > { %v2091_v15 = vor.u32 %v2259_v10, %v2088_v12  ;;  %v2257_v16 = vld [vmem:[%s296_s14 + $0x4] sm:$0xf]  ;;  %v2080_v17 = vld [vmem:[%s296_s14 + $0x8] sm:$0xf0]  ;;  %v2079_v18 = vor.u32 %v2258_v14, %v2078_v13  ;;  %v374_v27 = vld [vmem:[%s3459_s2 + $0x50] sm:$0xff]  ;;  %s324_s20 = scalar_lea.vmem [#allocation3], %s2011_s15 }
  0x28   : > { %711 = vmatpush.bf16.msra.mxu0 %v2087_v11  ;;  %2309 = vmatpush.bf16.msra.mxu2 %v2087_v11  ;;  %v2083_v22 = vor.u32 %v2257_v16, %v2080_v17  ;;  %v392_v26 = vld [vmem:[%s3459_s2 + $0xe0] sm:$0xff]  ;;  %v390_v28 = vld [vmem:[%s3459_s2 + $0xd0] sm:$0xff]  ;;  %v375_v29 = vld [vmem:[%s3459_s2 + $0x58] sm:$0xff]  ;;  %s1935_s21 = sshll.u32 %s324_s20, 4  ;;  %s1937_s22 = sshll.u32 %s1933_s19, 4  ;;  %s1936_s21 = int_to_ptr.vmem [resolvable:$true] %s1935_s21  ;;  %s1938_s22 = int_to_ptr.hbm [resolvable:$true] %s1937_s22 }
  0x29   : > { %800 = vmatpush.bf16.msra.mxu1 %v2091_v15  ;;  %2311 = vmatpush.bf16.msra.mxu3 %v2091_v15  ;;  %v391_v30 = vld [vmem:[%s3459_s2 + $0xd8] sm:$0xff]  ;;  %v2262_v31 = vld [vmem:[%s3458_s1 + $0x8] sm:$0xff]  ;;  %v388_v34 = vld [vmem:[%s3459_s2 + $0xc0] sm:$0xff]  ;;  %s1923_s28 = scalar_lea.sflag [#allocation4], %s2563_s9  ;;  %s2406_s23 = sshra.s32 %s1938_s22, 4  ;;  %s2407_s23 = int_to_ptr.hbm [resolvable:$true] %s2406_s23 }
  0x2a   : > { %v2272_v32 = vld [vmem:[%s3458_s1 + $0x58] sm:$0xff]  ;;  %v373_v33 = vld [vmem:[%s3459_s2 + $0x48] sm:$0xff]  ;;  %v372_v35 = vld [vmem:[%s3459_s2 + $0x40] sm:$0xff]  ;;  %s2408_s29 = scalar_lea.hbm %s2407_s23, 2  ;;  %s2412_s14 = scalar_lea.hbm %s3464_s7, 4 }
  0x2b   : > { %v370_v36 = vld [vmem:[%s3459_s2 + $0x30] sm:$0xff]  ;;  %v389_v37 = vld [vmem:[%s3459_s2 + $0xc8] sm:$0xff]  ;;  %v371_v38 = vld [vmem:[%s3459_s2 + $0x38] sm:$0xff]  ;;  %p2409_p13 = scmp.ne.s32.totalorder %s2407_s23, %s2408_s29  ;;  %p2413_p2 = scmp.lt.s32.totalorder %s2407_s23, %s3464_s7 }
  0x2c   : > { %553 = vperm.xlu1 %2386, %v395_v19   ;;  %712 = vmatpush.bf16.msra.mxu0 %v2079_v18  ;;  %v2263_v39 = vld [vmem:[%s3458_s1 + $0x10] sm:$0xff]  ;;  %v2273_v40 = vld [vmem:[%s3458_s1 + $0x60] sm:$0xff]  ;;  %v387_v41 = vld [vmem:[%s3459_s2 + $0xb8] sm:$0xff]  ;;  %p2414_p3 = scmp.lt.s32.totalorder %s2412_s14, %s2408_s29 }
  0x2d   : > { %473 = vperm.xlu0 %2385, %v379_v20   ;;  %463 = vperm.xlu2 %2387, %v377_v21   ;;  %v386_v42 = vld [vmem:[%s3459_s2 + $0xb0] sm:$0xff]  ;;  %v368_v43 = vld [vmem:[%s3459_s2 + $0x20] sm:$0xff]  ;;  %v369_v45 = vld [vmem:[%s3459_s2 + $0x28] sm:$0xff]  ;;  %p2410_p0 = pnand %p2409_p13, %p2535_p6 }
  0x2e   : > { %2310 = vmatpush.bf16.msra.mxu2 %v2079_v18  ;;  %801 = vmatpush.bf16.msra.mxu1 %v2083_v22  ;;  %v384_v44 = vld [vmem:[%s3459_s2 + $0xa0] sm:$0xff]  ;;  %v385_v46 = vld [vmem:[%s3459_s2 + $0xa8] sm:$0xff]  ;;  %v2264_v47 = vld [vmem:[%s3458_s1 + $0x18] sm:$0xff]  ;;  %p2415_p4 = por %p2414_p3, %p2413_p2 }
  0x2f   : > { %2312 = vmatpush.bf16.msra.mxu3 %v2083_v22  ;;  %2092 = vmatmul.msk.bf16.vlgmr.msra.gmra.mxu0 %vm656_vm0, %v2261_v23  ;;  %v2274_v48 = vld [vmem:[%s3458_s1 + $0x68] sm:$0xff]  ;;  %v367_v49 = vld [vmem:[%s3459_s2 + $0x18] sm:$0xff]  ;;  %v382_v50 = vld [vmem:[%s3459_s2 + $0x90] sm:$0xff]  ;;  %p2411_p1 = pneg %p2410_p0 }
  0x30   : > { %v366_v51 = vld [vmem:[%s3459_s2 + $0x10] sm:$0xff]  ;;  %v364_v52 = vld [vmem:[%s3459_s2] sm:$0xff]  ;;  %v383_v53 = vld [vmem:[%s3459_s2 + $0x98] sm:$0xff] }
  0x31   : > { %2102 = vmatmul.msk.bf16.vlgmr.msra.gmra.mxu2 %vm656_vm0, %v2271_v24  ;;  %2108 = vmatmul.msk.bf16.vlgmr.msra.gmra.mxu1 %vm656_vm0, %v2261_v23  ;;  %v365_v54 = vld [vmem:[%s3459_s2 + $0x8] sm:$0xff]  ;;  %v2265_v55 = vld [vmem:[%s3458_s1 + $0x20] sm:$0xff]  ;;  %v2275_v56 = vld [vmem:[%s3458_s1 + $0x70] sm:$0xff]  ;;  %p2416_p5 = pnand %p2415_p4, %p2411_p1 }
  0x32   : > { %2118 = vmatmul.msk.bf16.vlgmr.msra.gmra.mxu3 %vm656_vm0, %v2271_v24  ;;  %v381_v57 = vld [vmem:[%s3459_s2 + $0x88] sm:$0xff]  ;;  %v380_v58 = vld [vmem:[%s3459_s2 + $0x80] sm:$0xff]  ;;  %v1025_v59 = vld [vmem:[%s3461_s4 + $0x70] sm:$0xff] }
  0x33   : > { %v1041_v60 = vld [vmem:[%s3461_s4 + $0xf0] sm:$0xff]  ;;  %v1026_v61 = vld [vmem:[%s3461_s4 + $0x78] sm:$0xff]  ;;  %v2266_v63 = vld [vmem:[%s3458_s1 + $0x28] sm:$0xff] }
  0x34   : > { %543 = vperm.xlu1 %2386, %v393_v25   ;;  %v1042_v62 = vld [vmem:[%s3461_s4 + $0xf8] sm:$0xff]  ;;  %v1024_v1 = vld [vmem:[%s3461_s4 + $0x68] sm:$0xff]  ;;  %v1023_v2 = vld [vmem:[%s3461_s4 + $0x60] sm:$0xff] }
  0x35   : > { %538 = vperm.xlu0 %2385, %v392_v26   ;;  %448 = vperm.xlu2 %2387, %v374_v27   ;;  %v2276_v0 = vld [vmem:[%s3458_s1 + $0x78] sm:$0xff]  ;;  %v1039_v3 = vld [vmem:[%s3461_s4 + $0xe0] sm:$0xff]  ;;  %v1021_v4 = vld [vmem:[%s3461_s4 + $0x50] sm:$0xff] }
  0x36   : > { %v1040_v5 = vld [vmem:[%s3461_s4 + $0xe8] sm:$0xff]  ;;  %v1022_v6 = vld [vmem:[%s3461_s4 + $0x58] sm:$0xff]  ;;  %v2267_v7 = vld [vmem:[%s3458_s1 + $0x30] sm:$0xff] }
  0x37   : > { %v1038_v8 = vld [vmem:[%s3461_s4 + $0xd8] sm:$0xff]  ;;  %v1037_v9 = vld [vmem:[%s3461_s4 + $0xd0] sm:$0xff]  ;;  %v1019_v10 = vld [vmem:[%s3461_s4 + $0x40] sm:$0xff] }
  0x38   : > { %v1035_v11 = vld [vmem:[%s3461_s4 + $0xc0] sm:$0xff]  ;;  %v1020_v12 = vld [vmem:[%s3461_s4 + $0x48] sm:$0xff]  ;;  %v2268_v14 = vld [vmem:[%s3458_s1 + $0x38] sm:$0xff] }
  0x39   : > { %v1036_v13 = vld [vmem:[%s3461_s4 + $0xc8] sm:$0xff]  ;;  %v1018_v15 = vld [vmem:[%s3461_s4 + $0x38] sm:$0xff]  ;;  %v1017_v16 = vld [vmem:[%s3461_s4 + $0x30] sm:$0xff] }
  0x3a   : > { %v1033_v17 = vld [vmem:[%s3461_s4 + $0xb0] sm:$0xff]  ;;  %v1015_v18 = vld [vmem:[%s3461_s4 + $0x20] sm:$0xff]  ;;  %v1034_v19 = vld [vmem:[%s3461_s4 + $0xb8] sm:$0xff] }
  0x3b   : > { %v1016_v20 = vld [vmem:[%s3461_s4 + $0x28] sm:$0xff]  ;;  %v2269_v21 = vld [vmem:[%s3458_s1 + $0x40] sm:$0xff]  ;;  %v1013_v26 = vld [vmem:[%s3461_s4 + $0x10] sm:$0xff] }
  0x3c   : > { %528 = vperm.xlu1 %2386, %v390_v28   ;;  %v1032_v24 = vld [vmem:[%s3461_s4 + $0xa8] sm:$0xff]  ;;  %v1031_v25 = vld [vmem:[%s3461_s4 + $0xa0] sm:$0xff] }
  0x3d   : > { %453 = vperm.xlu0 %2385, %v375_v29   ;;  %533 = vperm.xlu2 %2387, %v391_v30  }
  0x3f   : > { %2093 = vmatmul.msk.bf16.gmra.mxu0 %vm656_vm0, %v2262_v31 }
  0x41   : > { %2103 = vmatmul.msk.bf16.gmra.mxu2 %vm656_vm0, %v2272_v32  ;;  %2109 = vmatmul.msk.bf16.gmra.mxu1 %vm656_vm0, %v2262_v31  ;;  %v1029_v31 = vld [vmem:[%s3461_s4 + $0x90] sm:$0xff] }
  0x42   : > { %2119 = vmatmul.msk.bf16.gmra.mxu3 %vm656_vm0, %v2272_v32  ;;  %v1014_v32 = vld [vmem:[%s3461_s4 + $0x18] sm:$0xff] }
  0x44   : > { %443 = vperm.xlu1 %2386, %v373_v33   ;;  %v1030_v33 = vld [vmem:[%s3461_s4 + $0x98] sm:$0xff] }
  0x45   : > { %518 = vperm.xlu2 %2387, %v388_v34   ;;  %438 = vperm.xlu0 %2385, %v372_v35   ;;  %v2270_v34 = vld [vmem:[%s3458_s1 + $0x48] sm:$0xff] }
  0x4c   : > { %428 = vperm.xlu1 %2386, %v370_v36  }
  0x4d   : > { %523 = vperm.xlu0 %2385, %v389_v37   ;;  %433 = vperm.xlu2 %2387, %v371_v38  }
  0x4f   : > { %2094 = vmatmul.msk.bf16.gmra.mxu0 %vm656_vm0, %v2263_v39 }
  0x51   : > { %2104 = vmatmul.msk.bf16.gmra.mxu2 %vm656_vm0, %v2273_v40  ;;  %2110 = vmatmul.msk.bf16.gmra.mxu1 %vm656_vm0, %v2263_v39  ;;  %v1012_v39 = vld [vmem:[%s3461_s4 + $0x8] sm:$0xff] }
  0x52   : > { %2120 = vmatmul.msk.bf16.gmra.mxu3 %vm656_vm0, %v2273_v40  ;;  %v1011_v40 = vld [vmem:[%s3461_s4] sm:$0xff] }
  0x54   : > { %513 = vperm.xlu1 %2386, %v387_v41   ;;  %v1027_v41 = vld [vmem:[%s3461_s4 + $0x80] sm:$0xff] }
  0x55   : > { %508 = vperm.xlu0 %2385, %v386_v42   ;;  %418 = vperm.xlu2 %2387, %v368_v43  }
  0x5c   : > { %498 = vperm.xlu1 %2386, %v384_v44  }
  0x5d   : > { %423 = vperm.xlu0 %2385, %v369_v45   ;;  %503 = vperm.xlu2 %2387, %v385_v46   ;;  %v1816_v46 = vld [vmem:[%s3463_s6] sm:$0xff] }
  0x5f   : > { %2095 = vmatmul.msk.bf16.gmra.mxu0 %vm656_vm0, %v2264_v47 }
  0x61   : > { %2105 = vmatmul.msk.bf16.gmra.mxu2 %vm656_vm0, %v2274_v48  ;;  %2111 = vmatmul.msk.bf16.gmra.mxu1 %vm656_vm0, %v2264_v47  ;;  %v1028_v47 = vld [vmem:[%s3461_s4 + $0x88] sm:$0xff] }
  0x62   : > { %2121 = vmatmul.msk.bf16.gmra.mxu3 %vm656_vm0, %v2274_v48 }
  0x64   : > { %413 = vperm.xlu1 %2386, %v367_v49  }
  0x65   : > { %488 = vperm.xlu2 %2387, %v382_v50   ;;  %408 = vperm.xlu0 %2385, %v366_v51  }
  0x6c   : > { %398 = vperm.xlu1 %2386, %v364_v52  }
  0x6d   : > { %493 = vperm.xlu0 %2385, %v383_v53   ;;  %403 = vperm.xlu2 %2387, %v365_v54  }
  0x6f   : > { %2096 = vmatmul.msk.bf16.gmra.mxu0 %vm656_vm0, %v2265_v55 }
  0x71   : > { %2106 = vmatmul.msk.bf16.gmra.mxu2 %vm656_vm0, %v2275_v56  ;;  %2112 = vmatmul.msk.bf16.gmra.mxu1 %vm656_vm0, %v2265_v55 }
  0x72   : > { %2122 = vmatmul.msk.bf16.gmra.mxu3 %vm656_vm0, %v2275_v56 }
  0x74   : > { %483 = vperm.xlu1 %2386, %v381_v57  }
  0x75   : > { %478 = vperm.xlu0 %2385, %v380_v58   ;;  %1115 = vperm.xlu2 %2387, %v1025_v59  }
  0x7c   : > { %1195 = vperm.xlu1 %2386, %v1041_v60  }
  0x7d   : > { %1120 = vperm.xlu0 %2385, %v1026_v61   ;;  %1200 = vperm.xlu2 %2387, %v1042_v62  }
  0x7f   : > { %2097 = vmatmul.msk.bf16.gmra.mxu0 %vm656_vm0, %v2266_v63  ;;  %v2868_v52 = vpop.permute.xlu2 %458 }
  0x81   : > { %2107 = vmatmul.msk.bf16.gmra.mxu2 %vm656_vm0, %v2276_v0  ;;  %2113 = vmatmul.msk.bf16.gmra.mxu1 %vm656_vm0, %v2266_v63 }
  0x82   : > { %2123 = vmatmul.msk.bf16.gmra.mxu3 %vm656_vm0, %v2276_v0 }
  0x84   : > { %1110 = vperm.xlu1 %2386, %v1024_v1  }
  0x85   : > { %1105 = vperm.xlu0 %2385, %v1023_v2   ;;  %1185 = vperm.xlu2 %2387, %v1039_v3  }
  0x87   : > { %v2888_v63 = vpop.permute.xlu2 %463 }
  0x8c   : > { %1095 = vperm.xlu1 %2386, %v1021_v4  }
  0x8d   : > { %1190 = vperm.xlu0 %2385, %v1040_v5   ;;  %1100 = vperm.xlu2 %2387, %v1022_v6  }
  0x8f   : > { %2098 = vmatmul.msk.bf16.gmra.mxu0 %vm656_vm0, %v2267_v7  ;;  %v2896_v6 = vpop.permute.xlu2 %448 }
  0x91   : > { %2114 = vmatmul.msk.bf16.gmra.mxu1 %vm656_vm0, %v2267_v7 }
  0x94   : > { %1180 = vperm.xlu1 %2386, %v1038_v8  }
  0x95   : > { %1175 = vperm.xlu0 %2385, %v1037_v9   ;;  %1085 = vperm.xlu2 %2387, %v1019_v10  }
  0x96   : > { %v549_v55 = vpop.permute.xlu1 %548 }
  0x97   : > { %v2878_v58 = vpop.permute.xlu0 %468 }
  0x9c   : > { %1165 = vperm.xlu1 %2386, %v1035_v11  }
  0x9d   : > { %1090 = vperm.xlu0 %2385, %v1020_v12   ;;  %1170 = vperm.xlu2 %2387, %v1036_v13   ;;  %v534_v13 = vpop.permute.xlu2 %533 }
  0x9e   : > { %v554_v0 = vpop.permute.xlu1 %553 }
  0x9f   : > { %2099 = vmatmul.msk.bf16.gmra.mxu0 %vm656_vm0, %v2268_v14  ;;  %v2892_v3 = vpop.permute.xlu0 %473 }
  0xa1   : > { %2115 = vmatmul.msk.bf16.gmra.mxu1 %vm656_vm0, %v2268_v14 }
  0xa4   : > { %1080 = vperm.xlu1 %2386, %v1018_v15  }
  0xa5   : > { %1075 = vperm.xlu0 %2385, %v1017_v16   ;;  %1155 = vperm.xlu2 %2387, %v1033_v17  }
  0xa6   : > { %v544_v7 = vpop.permute.xlu1 %543 }
  0xa7   : > { %v539_v12 = vpop.permute.xlu0 %538 }
  0xac   : > { %1065 = vperm.xlu1 %2386, %v1015_v18   ;;  %v2792_v22 = vpop.f32.mrf.mxu0 }
  0xad   : > { %3477 = vst [vmem:[#allocation6_spill] sm:$0xff] %v2792_v22  ;;  %1160 = vperm.xlu0 %2385, %v1034_v19   ;;  %1070 = vperm.xlu2 %2387, %v1016_v20  }
  0xae   : > { %v2794_v23 = vpop.f32.mrf.mxu1  ;;  %v529_v14 = vpop.permute.xlu1 %528 }
  0xaf   : > { %3478 = vst [vmem:[#allocation7_spill] sm:$0xff] %v2794_v23  ;;  %2100 = vmatmul.msk.bf16.gmra.mxu0 %vm656_vm0, %v2269_v21  ;;  %v2906_v19 = vpop.permute.xlu0 %453 }
  0xb1   : > { %2116 = vmatmul.msk.bf16.gmra.mxu1 %vm656_vm0, %v2269_v21 }
  0xb4   : > { %v2807_v27 = vpop.f32.mrf.mxu2  ;;  %1150 = vperm.xlu1 %2386, %v1032_v24   ;;  %v2809_v28 = vpop.f32.mrf.mxu0 }
  0xb5   : > { %3479 = vst [vmem:[#allocation8_spill] sm:$0xff] %v2809_v28  ;;  %v2811_v29 = vpop.f32.mrf.mxu3  ;;  %1145 = vperm.xlu0 %2385, %v1031_v25   ;;  %1055 = vperm.xlu2 %2387, %v1013_v26   ;;  %v519_v24 = vpop.permute.xlu2 %518 }
  0xb6   : > { %v2813_v30 = vpop.f32.mrf.mxu1  ;;  %v2910_v26 = vpop.permute.xlu1 %443 }
  0xb7   : > { %3480 = vst [vmem:[#allocation9_spill] sm:$0xff] %v2813_v30 }
  0xbc   : > { %v2827_v35 = vpop.f32.mrf.mxu2  ;;  %1135 = vperm.xlu1 %2386, %v1029_v31   ;;  %v2829_v36 = vpop.f32.mrf.mxu0 }
  0xbd   : > { %3481 = vst [vmem:[#allocation10_spill] sm:$0xff] %v2829_v36  ;;  %v2831_v37 = vpop.f32.mrf.mxu3  ;;  %1060 = vperm.xlu0 %2385, %v1014_v32   ;;  %1140 = vperm.xlu2 %2387, %v1030_v33   ;;  %v2914_v32 = vpop.permute.xlu0 %438 }
  0xbe   : > { %v2833_v38 = vpop.f32.mrf.mxu1 }
  0xbf   : > { %3482 = vst [vmem:[#allocation11_spill] sm:$0xff] %v2833_v38  ;;  %2101 = vmatmul.msk.bf16.gmra.mxu0 %vm656_vm0, %v2270_v34 }
  0xc1   : > { %2117 = vmatmul.msk.bf16.gmra.mxu1 %vm656_vm0, %v2270_v34 }
  0xc4   : > { %v2846_v42 = vpop.f32.mrf.mxu2  ;;  %1050 = vperm.xlu1 %2386, %v1012_v39   ;;  %v2848_v43 = vpop.f32.mrf.mxu0 }
  0xc5   : > { %3483 = vst [vmem:[#allocation12_spill] sm:$0xff] %v2848_v43  ;;  %v2850_v44 = vpop.f32.mrf.mxu3  ;;  %1045 = vperm.xlu0 %2385, %v1011_v40   ;;  %1125 = vperm.xlu2 %2387, %v1027_v41   ;;  %v2920_v41 = vpop.permute.xlu2 %433 }
  0xc6   : > { %v2852_v45 = vpop.f32.mrf.mxu1  ;;  %3495 = vst [vmem:[#allocation24_spill] sm:$0xff] %v2920_v41  ;;  %v524_v22 = vpop.permute.xlu0 %523 }
  0xc7   : > { %3484 = vst [vmem:[#allocation13_spill] sm:$0xff] %v2852_v45 }
  0xcc   : > { %v2860_v48 = vpop.f32.mrf.mxu2  ;;  %1819 = vperm.xlu1 %2386, %v1816_v46   ;;  %v2862_v49 = vpop.f32.mrf.mxu0 }
  0xcd   : > { %3485 = vst [vmem:[#allocation14_spill] sm:$0xff] %v2862_v49  ;;  %v2864_v50 = vpop.f32.mrf.mxu3  ;;  %1130 = vperm.xlu0 %2385, %v1028_v47   ;;  %v2922_v46 = vpop.permute.xlu1 %428 }
  0xce   : > { %v2866_v51 = vpop.f32.mrf.mxu1  ;;  %3496 = vst [vmem:[#allocation25_spill] sm:$0xff] %v2922_v46  ;;  %v2928_v46 = vpop.permute.xlu2 %418 }
  0xcf   : > { %3486 = vst [vmem:[#allocation15_spill] sm:$0xff] %v2866_v51 }
  0xd4   : > { %v2870_v53 = vpop.f32.mrf.mxu2  ;;  %v2872_v54 = vpop.f32.mrf.mxu0 }
  0xd5   : > { %3487 = vst [vmem:[#allocation16_spill] sm:$0xff] %v2872_v54  ;;  %v2874_v56 = vpop.f32.mrf.mxu3 }
  0xd6   : > { %v2876_v57 = vpop.f32.mrf.mxu1 }
  0xd7   : > { %3488 = vst [vmem:[#allocation17_spill] sm:$0xff] %v2876_v57 }
  0xdc   : > { %v2880_v59 = vpop.f32.mrf.mxu2  ;;  %v2882_v60 = vpop.f32.mrf.mxu0 }
  0xdd   : > { %3489 = vst [vmem:[#allocation18_spill] sm:$0xff] %v2882_v60  ;;  %v2884_v61 = vpop.f32.mrf.mxu3 }
  0xde   : > { %v2886_v62 = vpop.f32.mrf.mxu1 }
  0xdf   : > { %3490 = vst [vmem:[#allocation19_spill] sm:$0xff] %v2886_v62 }
  0xe4   : > { %v779_v1 = vpop.f32.mrf.mxu2  ;;  %v2890_v2 = vpop.f32.mrf.mxu0 }
  0xe5   : > { %3491 = vst [vmem:[#allocation20_spill] sm:$0xff] %v2890_v2  ;;  %v868_v4 = vpop.f32.mrf.mxu3 }
  0xe6   : > { %v2894_v5 = vpop.f32.mrf.mxu1 }
  0xe7   : > { %3492 = vst [vmem:[#allocation21_spill] sm:$0xff] %v2894_v5 }
  0xec   : > { %v781_v8 = vpop.f32.mrf.mxu2  ;;  %v2898_v9 = vpop.f32.mrf.mxu0 }
  0xed   : > { %v870_v10 = vpop.f32.mrf.mxu3 }
  0xee   : > { %v2900_v11 = vpop.f32.mrf.mxu1 }
  0xef   : > { %3493 = vst [vmem:[#allocation22_spill] sm:$0xff] %v2900_v11 }
  0xf4   : > { %v784_v15 = vpop.f32.mrf.mxu2  ;;  %v2902_v16 = vpop.f32.mrf.mxu0 }
  0xf5   : > { %v873_v17 = vpop.f32.mrf.mxu3  ;;  %v785_v49 = vadd.f32 %v784_v15, %v539_v12  ;;  %v504_v15 = vpop.permute.xlu2 %503 }
  0xf6   : > { %v2904_v18 = vpop.f32.mrf.mxu1  ;;  %v874_v62 = vadd.f32 %v873_v17, %v539_v12  ;;  %v856_v17 = vadd.f32 %v2831_v37, %v504_v15 }
  0xf7   : > { %3494 = vst [vmem:[#allocation23_spill] sm:$0xff] %v2904_v18  ;;  %v514_v18 = vpop.permute.xlu1 %513 }
  0xf8   : > { %v940_v12 = vmax.f32 %v874_v62, 0.0  ;;  %v772_v62 = vadd.f32 %v2860_v48, %v514_v18  ;;  %v926_v37 = vmax.f32 %v856_v17, 0.0  ;;  %v3499_v17 = vld [vmem:[#allocation24_spill] sm:$0xff] }
  0xfc   : > { %v786_v20 = vpop.f32.mrf.mxu2  ;;  %v2908_v21 = vpop.f32.mrf.mxu0 }
  0xfd   : > { %v875_v25 = vpop.f32.mrf.mxu3  ;;  %v787_v38 = vadd.f32 %v786_v20, %v544_v7  ;;  %v869_v20 = vadd.f32 %v868_v4, %v529_v14 }
  0xfe   : > { %v2912_v31 = vpop.f32.mrf.mxu1  ;;  %v876_v43 = vadd.f32 %v875_v25, %v544_v7  ;;  %v929_v25 = vmax.f32 %v772_v62, 0.0  ;;  %v740_v62 = vadd.f32 %v2908_v21, %v2896_v6  ;;  %v735_v21 = vadd.f32 %v2898_v9, %v2914_v32 }
  0xff   : > { %v936_v4 = vmax.f32 %v869_v20, 0.0 }
 0x100   : > { %v942_v11 = vmax.f32 %v876_v43, 0.0 }
 0x104   : > { %v789_v33 = vpop.f32.mrf.mxu2  ;;  %v2916_v34 = vpop.f32.mrf.mxu0 }
 0x105   : > { %v878_v39 = vpop.f32.mrf.mxu3  ;;  %v790_v47 = vadd.f32 %v789_v33, %v549_v55  ;;  %v782_v33 = vadd.f32 %v781_v8, %v534_v13 }
 0x106   : > { %v2918_v40 = vpop.f32.mrf.mxu1  ;;  %v879_v30 = vadd.f32 %v878_v39, %v549_v55  ;;  %v780_v55 = vadd.f32 %v779_v1, %v529_v14  ;;  %v941_v39 = vmax.f32 %v787_v38, 0.0 }
 0x107   : > { %v943_v54 = vmax.f32 %v790_v47, 0.0  ;;  %v937_v8 = vmax.f32 %v782_v33, 0.0 }
 0x108   : > { %v944_v60 = vmax.f32 %v879_v30, 0.0  ;;  %v935_v1 = vmax.f32 %v780_v55, 0.0 }
 0x10c   : > { %v791_v28 = vpop.f32.mrf.mxu2  ;;  %v2924_v23 = vpop.f32.mrf.mxu0 }
 0x10d   : > { %v792_v45 = vadd.f32 %v791_v28, %v554_v0  ;;  %v880_v36 = vpop.f32.mrf.mxu3  ;;  %v871_v28 = vadd.f32 %v870_v10, %v534_v13  ;;  %v973_v10 = vpack.c.bf16 %v937_v8, %v935_v1  ;;  %v861_v13 = vadd.f32 %v2864_v50, %v514_v18 }
 0x10e   : > { %v881_v57 = vadd.f32 %v880_v36, %v554_v0  ;;  %v2926_v51 = vpop.f32.mrf.mxu1  ;;  %v939_v36 = vmax.f32 %v785_v49, 0.0  ;;  %v775_v0 = vadd.f32 %v2870_v53, %v519_v24  ;;  %v509_v49 = vpop.permute.xlu0 %508 }
 0x10f   : > { %v945_v5 = vmax.f32 %v792_v45, 0.0  ;;  %v864_v45 = vadd.f32 %v2874_v56, %v519_v24  ;;  %v770_v53 = vadd.f32 %v2846_v42, %v509_v49  ;;  %v859_v56 = vadd.f32 %v2850_v44, %v509_v49  ;;  %v499_v42 = vpop.permute.xlu1 %498 }
 0x110   : > { %v946_v2 = vmax.f32 %v881_v57, 0.0  ;;  %v777_v57 = vadd.f32 %v2880_v59, %v524_v22  ;;  %v975_v38 = vpack.c.bf16 %v941_v39, %v939_v36  ;;  %v765_v48 = vadd.f32 %v2807_v27, %v499_v42 }
 0x111   : > { %v977_v41 = vpack.c.bf16 %v945_v5, %v943_v54  ;;  %v866_v54 = vadd.f32 %v2884_v61, %v524_v22  ;;  %v938_v5 = vmax.f32 %v871_v28, 0.0  ;;  %v932_v14 = vmax.f32 %v864_v45, 0.0 }
 0x112   : > { %v978_v7 = vpack.c.bf16 %v946_v2, %v944_v60  ;;  %v976_v60 = vpack.c.bf16 %v942_v11, %v940_v12  ;;  %v931_v2 = vmax.f32 %v775_v0, 0.0  ;;  %v933_v59 = vmax.f32 %v777_v57, 0.0 }
 0x113   : > { %1452 = vmatpush.bf16.msrb.mxu3 %v977_v41  ;;  %v934_v22 = vmax.f32 %v866_v54, 0.0  ;;  %v974_v61 = vpack.c.bf16 %v938_v5, %v936_v4  ;;  %v767_v11 = vadd.f32 %v2827_v35, %v504_v15  ;;  %v927_v24 = vmax.f32 %v770_v53, 0.0 }
 0x114   : > { %1630 = vmatpush.bf16.msrb.mxu1 %v978_v7  ;;  %v746_v30 = vpop.f32.mrf.mxu0  ;;  %v971_v41 = vpack.c.bf16 %v933_v59, %v931_v2  ;;  %v928_v47 = vmax.f32 %v859_v56, 0.0  ;;  %v930_v55 = vmax.f32 %v861_v13, 0.0  ;;  %v854_v50 = vadd.f32 %v2811_v29, %v499_v42  ;;  %v3500_v42 = vld [vmem:[#allocation20_spill] sm:$0xff] }
 0x115   : > { %v972_v33 = vpack.c.bf16 %v934_v22, %v932_v14  ;;  %v925_v39 = vmax.f32 %v767_v11, 0.0  ;;  %v923_v35 = vmax.f32 %v765_v48, 0.0  ;;  %v969_v20 = vpack.c.bf16 %v929_v25, %v927_v24  ;;  %v3498_v22 = vld [vmem:[#allocation23_spill] sm:$0xff]  ;;  %v2974_v48 = vpop.permute.xlu2 %488 }
 0x116   : > { %v835_v43 = vpop.f32.mrf.mxu1  ;;  %v924_v28 = vmax.f32 %v854_v50, 0.0  ;;  %v970_v7 = vpack.c.bf16 %v930_v55, %v928_v47  ;;  %v747_v0 = vadd.f32 %v746_v30, %v2888_v63  ;;  %v745_v57 = vadd.f32 %v2924_v23, %v2868_v52  ;;  %v3504_v50 = vld [vmem:[#allocation21_spill] sm:$0xff] }
 0x117   : > { %1453 = vmatpush.bf16.msrb.mxu3 %v975_v38  ;;  %v967_v12 = vpack.c.bf16 %v925_v39, %v923_v35  ;;  %v424_v38 = vpop.permute.xlu0 %423  ;;  %v836_v54 = vadd.f32 %v835_v43, %v2888_v63  ;;  %v742_v30 = vadd.f32 %v2916_v34, %v2906_v19  ;;  %v831_v63 = vadd.f32 %v2918_v40, %v2906_v19  ;;  %v3497_v19 = vld [vmem:[#allocation22_spill] sm:$0xff] }
 0x118   : > { %1631 = vmatpush.bf16.msrb.mxu1 %v976_v60  ;;  %v968_v8 = vpack.c.bf16 %v926_v37, %v924_v28  ;;  %v909_v49 = vmax.f32 %v747_v0, 0.0  ;;  %v907_v43 = vmax.f32 %v745_v57, 0.0  ;;  %v737_v34 = vadd.f32 %v2902_v16, %v2910_v26  ;;  %v3505_v28 = vld [vmem:[#allocation16_spill] sm:$0xff]  ;;  %v3506_v0 = vld [vmem:[#allocation14_spill] sm:$0xff]  ;;  %v3508_v57 = vld [vmem:[#allocation17_spill] sm:$0xff] }
 0x119   : > { %v824_v40 = vadd.f32 %v3497_v19, %v2914_v32  ;;  %v826_v16 = vadd.f32 %v3498_v22, %v2910_v26  ;;  %v906_v15 = vmax.f32 %v831_v63, 0.0  ;;  %v3501_v32 = vld [vmem:[#allocation25_spill] sm:$0xff]  ;;  %v3503_v26 = vld [vmem:[#allocation19_spill] sm:$0xff] }
 0x11a   : > { %v959_v13 = vpack.c.bf16 %v909_v49, %v907_v43  ;;  %v901_v24 = vmax.f32 %v737_v34, 0.0  ;;  %v819_v55 = vadd.f32 %v3503_v26, %v3501_v32 }
 0x11b   : > { %1454 = vmatpush.bf16.msrb.mxu3 %v973_v10  ;;  %v900_v39 = vmax.f32 %v824_v40, 0.0  ;;  %v902_v35 = vmax.f32 %v826_v16, 0.0  ;;  %v3513_v40 = vld [vmem:[#allocation6_spill] sm:$0xff] }
 0x11c   : > { %1632 = vmatpush.bf16.msrb.mxu1 %v974_v61  ;;  %v749_v44 = vpop.f32.mrf.mxu0  ;;  %v903_v61 = vmax.f32 %v740_v62, 0.0 }
 0x11d   : > { %v750_v36 = vadd.f32 %v749_v44, %v2878_v58  ;;  %v732_v44 = vadd.f32 %v3500_v42, %v3499_v17 }
 0x11e   : > { %v838_v18 = vpop.f32.mrf.mxu1 }
 0x11f   : > { %1455 = vmatpush.bf16.msrb.mxu3 %v971_v41  ;;  %v839_v45 = vadd.f32 %v838_v18, %v2878_v58  ;;  %v911_v4 = vmax.f32 %v750_v36, 0.0  ;;  %v834_v58 = vadd.f32 %v2926_v51, %v2868_v52  ;;  %v829_v51 = vadd.f32 %v2912_v31, %v2896_v6  ;;  %v414_v6 = vpop.permute.xlu1 %413  ;;  %v409_v31 = vpop.permute.xlu0 %408  ;;  %v3502_v41 = vld [vmem:[#allocation18_spill] sm:$0xff] }
 0x120   : > { %1633 = vmatpush.bf16.msrb.mxu1 %v972_v33  ;;  %v905_v52 = vmax.f32 %v742_v30, 0.0  ;;  %v730_v47 = vadd.f32 %v3502_v41, %v3501_v32  ;;  %v821_v18 = vadd.f32 %v3504_v50, %v3499_v17  ;;  %v899_v33 = vmax.f32 %v735_v21, 0.0  ;;  %v3515_v17 = vld [vmem:[#allocation8_spill] sm:$0xff]  ;;  %v2126_v50 = vld [vmem:[%s3460_s3] sm:$0xf] }
 0x121   : > { %v912_v53 = vmax.f32 %v839_v45, 0.0  ;;  %v908_v10 = vmax.f32 %v834_v58, 0.0  ;;  %v904_v25 = vmax.f32 %v829_v51, 0.0  ;;  %v897_v36 = vmax.f32 %v732_v44, 0.0  ;;  %v3509_v58 = vld [vmem:[#allocation12_spill] sm:$0xff] }
 0x122   : > { %v957_v9 = vpack.c.bf16 %v905_v52, %v903_v61  ;;  %v725_v45 = vadd.f32 %v3506_v0, %v2928_v46  ;;  %v722_v49 = vadd.f32 %v3509_v58, %v414_v6  ;;  %v3514_v61 = vld [vmem:[#allocation7_spill] sm:$0xff] }
 0x123   : > { %1456 = vmatpush.bf16.msrb.mxu3 %v969_v20  ;;  %v958_v20 = vpack.c.bf16 %v906_v15, %v904_v25 }
 0x124   : > { %1634 = vmatpush.bf16.msrb.mxu1 %v970_v7  ;;  %v751_v27 = vpop.f32.mrf.mxu0  ;;  %v727_v7 = vadd.f32 %v3505_v28, %v424_v38  ;;  %v891_v62 = vmax.f32 %v725_v45, 0.0  ;;  %v889_v21 = vmax.f32 %v722_v49, 0.0 }
 0x125   : > { %v752_v29 = vadd.f32 %v751_v27, %v2892_v3  ;;  %v955_v27 = vpack.c.bf16 %v901_v24, %v899_v33  ;;  %v3516_v24 = vld [vmem:[#allocation9_spill] sm:$0xff] }
 0x126   : > { %v840_v1 = vpop.f32.mrf.mxu1  ;;  %v893_v30 = vmax.f32 %v727_v7, 0.0 }
 0x127   : > { %v913_v5 = vmax.f32 %v752_v29, 0.0  ;;  %v841_v60 = vadd.f32 %v840_v1, %v2892_v3  ;;  %1457 = vmatpush.bf16.msrb.mxu3 %v967_v12  ;;  %v910_v3 = vmax.f32 %v836_v54, 0.0  ;;  %v3507_v29 = vld [vmem:[#allocation15_spill] sm:$0xff]  ;;  %v816_v1 = vadd.f32 %v3508_v57, %v424_v38  ;;  %v399_v43 = vpop.permute.xlu1 %398  ;;  %v494_v51 = vpop.permute.xlu0 %493 }
 0x128   : > { %1635 = vmatpush.bf16.msrb.mxu1 %v968_v8  ;;  %v814_v12 = vadd.f32 %v3507_v29, %v2928_v46  ;;  %v895_v54 = vmax.f32 %v730_v47, 0.0  ;;  %v3511_v46 = vld [vmem:[#allocation13_spill] sm:$0xff]  ;;  %v3512_v38 = vld [vmem:[#allocation11_spill] sm:$0xff]  ;;  %v715_v22 = vadd.f32 %v3513_v40, %v399_v43  ;;  %v951_v16 = vpack.c.bf16 %v893_v30, %v891_v62  ;;  %v2284_v40 = vld [vmem:[%s3460_s3 + $0x34] sm:$0xf0] }
 0x129   : > { %v914_v23 = vmax.f32 %v841_v60, 0.0  ;;  %v961_v56 = vpack.c.bf16 %v913_v5, %v911_v4  ;;  %v960_v11 = vpack.c.bf16 %v910_v3, %v908_v10  ;;  %v896_v4 = vmax.f32 %v819_v55, 0.0  ;;  %v404_v10 = vpop.permute.xlu2 %403 }
 0x12a   : > { %v898_v5 = vmax.f32 %v821_v18, 0.0  ;;  %v956_v60 = vpack.c.bf16 %v902_v35, %v900_v39  ;;  %v892_v63 = vmax.f32 %v814_v12, 0.0  ;;  %v894_v3 = vmax.f32 %v816_v1, 0.0  ;;  %v2278_v18 = vld [vmem:[%s3460_s3 + $0x4] sm:$0xf0] }
 0x12b   : > { %1363 = vmatpush.bf16.msrb.mxu2 %v961_v56  ;;  %v962_v2 = vpack.c.bf16 %v914_v23, %v912_v53  ;;  %v3510_v53 = vld [vmem:[#allocation10_spill] sm:$0xff]  ;;  %v953_v56 = vpack.c.bf16 %v897_v36, %v895_v54  ;;  %v809_v34 = vadd.f32 %v3512_v38, %v409_v31  ;;  %v804_v15 = vadd.f32 %v3514_v61, %v399_v43  ;;  %v2280_v43 = vld [vmem:[%s3460_s3 + $0x14] sm:$0xf0]  ;;  %v2283_v61 = vld [vmem:[%s3460_s3 + $0x34] sm:$0xf] }
 0x12c   : > { %v2960_v59 = vpop.f32.mrf.mxu0  ;;  %v720_v23 = vadd.f32 %v3510_v53, %v409_v31  ;;  %v954_v52 = vpack.c.bf16 %v898_v5, %v896_v4  ;;  %v717_v42 = vadd.f32 %v3515_v17, %v404_v10  ;;  %v952_v31 = vpack.c.bf16 %v894_v3, %v892_v63  ;;  %v2128_v53 = vld [vmem:[%s3460_s3 + $0x8] sm:$0xf0]  ;;  %v2134_v63 = vld [vmem:[%s3460_s3 + $0x10] sm:$0xf] }
 0x12d   : > { %1541 = vmatpush.bf16.msrb.mxu0 %v962_v2  ;;  %v811_v2 = vadd.f32 %v3511_v46, %v414_v6  ;;  %v888_v6 = vmax.f32 %v809_v34, 0.0  ;;  %v806_v25 = vadd.f32 %v3516_v24, %v404_v10  ;;  %v884_v41 = vmax.f32 %v804_v15, 0.0  ;;  %v2279_v46 = vld [vmem:[%s3460_s3 + $0x14] sm:$0xf]  ;;  %v2142_v34 = vld [vmem:[%s3460_s3 + $0x20] sm:$0xf] }
 0x12e   : > { %v2968_v14 = vpop.f32.mrf.mxu1  ;;  %v887_v19 = vmax.f32 %v720_v23, 0.0  ;;  %v885_v47 = vmax.f32 %v717_v42, 0.0  ;;  %v2127_v12 = vor.u32 %v2278_v18, %v2126_v50  ;;  %v2135_v3 = vor.u32 %v2280_v43, %v2134_v63  ;;  %v2281_v10 = vld [vmem:[%s3460_s3 + $0x24] sm:$0xf]  ;;  %v2152_v15 = vld [vmem:[%s3460_s3 + $0x38] sm:$0xf0] }
 0x12f   : > { %1364 = vmatpush.bf16.msrb.mxu2 %v959_v13  ;;  %v890_v44 = vmax.f32 %v811_v2, 0.0  ;;  %v886_v33 = vmax.f32 %v806_v25, 0.0  ;;  %v484_v39 = vpop.permute.xlu1 %483  ;;  %v2136_v2 = vld [vmem:[%s3460_s3 + $0x18] sm:$0xf0]  ;;  %v2155_v17 = vor.u32 %v2283_v61, %v2152_v15  ;;  %v2166_v50 = vld [vmem:[%s3460_s3 + $0x50] sm:$0xf] }
 0x130   : > { %v949_v32 = vpack.c.bf16 %v889_v21, %v887_v19  ;;  %v2139_v38 = vor.u32 %v2279_v46, %v2136_v2  ;;  %v2150_v19 = vld [vmem:[%s3460_s3 + $0x30] sm:$0xf]  ;;  %v2288_v18 = vld [vmem:[%s3460_s3 + $0x54] sm:$0xf0]  ;;  %v2190_v63 = vld [vmem:[%s3460_s3 + $0x80] sm:$0xf] }
 0x131   : > { %1542 = vmatpush.bf16.msrb.mxu0 %v960_v11  ;;  %v950_v55 = vpack.c.bf16 %v890_v44, %v888_v6  ;;  %v948_v29 = vpack.c.bf16 %v886_v33, %v884_v41  ;;  %v2158_v44 = vld [vmem:[%s3460_s3 + $0x40] sm:$0xf]  ;;  %v2286_v6 = vld [vmem:[%s3460_s3 + $0x44] sm:$0xf0]  ;;  %v3070_v41 = vpop.permute.xlu2 %1115  ;;  %v2167_v33 = vor.u32 %v2288_v18, %v2166_v50  ;;  %v2198_v15 = vld [vmem:[%s3460_s3 + $0x90] sm:$0xf] }
 0x132   : > { %v2294_v43 = vld [vmem:[%s3460_s3 + $0x84] sm:$0xf0] }
 0x133   : > { %1365 = vmatpush.bf16.msrb.mxu2 %v957_v9  ;;  %v883_v9 = vmax.f32 %v715_v22, 0.0  ;;  %v2191_v46 = vor.u32 %v2294_v43, %v2190_v63 }
 0x134   : > { %v756_v37 = vpop.f32.mrf.mxu0 }
 0x135   : > { %1543 = vmatpush.bf16.msrb.mxu0 %v958_v20  ;;  %v479_v20 = vpop.permute.xlu0 %478  ;;  %v757_v28 = vadd.f32 %v756_v37, %v484_v39 }
 0x136   : > { %v845_v8 = vpop.f32.mrf.mxu1  ;;  %v755_v0 = vadd.f32 %v2960_v59, %v479_v20  ;;  %v844_v5 = vadd.f32 %v2968_v14, %v479_v20  ;;  %v2287_v20 = vld [vmem:[%s3460_s3 + $0x54] sm:$0xf] }
 0x137   : > { %1366 = vmatpush.bf16.msrb.mxu2 %v955_v27  ;;  %v947_v27 = vpack.c.bf16 %v885_v47, %v883_v9  ;;  %v846_v57 = vadd.f32 %v845_v8, %v484_v39  ;;  %v2277_v8 = vld [vmem:[%s3460_s3 + $0x4] sm:$0xf] }
 0x138   : > { %v915_v58 = vmax.f32 %v755_v0, 0.0  ;;  %v916_v14 = vmax.f32 %v844_v5, 0.0  ;;  %v2285_v9 = vld [vmem:[%s3460_s3 + $0x44] sm:$0xf]  ;;  %v2174_v0 = vld [vmem:[%s3460_s3 + $0x60] sm:$0xf] }
 0x139   : > { %1544 = vmatpush.bf16.msrb.mxu0 %v956_v60  ;;  %v917_v60 = vmax.f32 %v757_v28, 0.0  ;;  %v918_v49 = vmax.f32 %v846_v57, 0.0  ;;  %v3082_v39 = vpop.permute.xlu2 %1200  ;;  %v2168_v28 = vld [vmem:[%s3460_s3 + $0x58] sm:$0xf0] }
 0x13a   : > { %3520 = vst [vmem:[#allocation20_spill] sm:$0xff] %v3082_v39 }
 0x13b   : > { %1367 = vmatpush.bf16.msrb.mxu2 %v953_v56  ;;  %v963_v23 = vpack.c.bf16 %v917_v60, %v915_v58  ;;  %v2131_v56 = vor.u32 %v2277_v8, %v2128_v53  ;;  %v964_v62 = vpack.c.bf16 %v918_v49, %v916_v14  ;;  %v2291_v53 = vld [vmem:[%s3460_s3 + $0x74] sm:$0xf]  ;;  %v2184_v14 = vld [vmem:[%s3460_s3 + $0x78] sm:$0xf0] }
 0x13c   : > { %v759_v13 = vpop.f32.mrf.mxu0 }
 0x13d   : > { %1545 = vmatpush.bf16.msrb.mxu0 %v954_v52  ;;  %v760_v26 = vadd.f32 %v759_v13, %v2974_v48  ;;  %v2144_v13 = vld [vmem:[%s3460_s3 + $0x28] sm:$0xf0]  ;;  %v3042_v22 = vpop.permute.xlu0 %1120 }
 0x13e   : > { %v848_v11 = vpop.f32.mrf.mxu1  ;;  %v2147_v21 = vor.u32 %v2281_v10, %v2144_v13 }
 0x13f   : > { %1368 = vmatpush.bf16.msrb.mxu2 %v951_v16  ;;  %v849_v7 = vadd.f32 %v848_v11, %v2974_v48  ;;  %v919_v1 = vmax.f32 %v760_v26, 0.0  ;;  %v2151_v16 = vor.u32 %v2284_v40, %v2150_v19  ;;  %v3050_v11 = vpop.permute.xlu1 %1195 }
 0x140   : > { %3517 = vst [vmem:[#allocation22_spill] sm:$0xff] %v3050_v11 }
 0x141   : > { %1546 = vmatpush.bf16.msrb.mxu0 %v952_v31  ;;  %v920_v30 = vmax.f32 %v849_v7, 0.0  ;;  %v2159_v31 = vor.u32 %v2286_v6, %v2158_v44 }
 0x143   : > { %1369 = vmatpush.bf16.msrb.mxu2 %v949_v32  ;;  %v2160_v32 = vld [vmem:[%s3460_s3 + $0x48] sm:$0xf0] }
 0x144   : > { %v761_v35 = vpop.f32.mrf.mxu0  ;;  %v2163_v47 = vor.u32 %v2285_v9, %v2160_v32 }
 0x145   : > { %1547 = vmatpush.bf16.msrb.mxu0 %v950_v55  ;;  %v762_v36 = vadd.f32 %v761_v35, %v494_v51  ;;  %v3052_v42 = vpop.permute.xlu0 %1105 }
 0x146   : > { %v850_v45 = vpop.f32.mrf.mxu1 }
 0x147   : > { %v921_v54 = vmax.f32 %v762_v36, 0.0  ;;  %v851_v4 = vadd.f32 %v850_v45, %v494_v51  ;;  %1370 = vmatpush.bf16.msrb.mxu2 %v947_v27  ;;  %v2282_v51 = vld [vmem:[%s3460_s3 + $0x24] sm:$0xf0]  ;;  %v3060_v24 = vpop.permute.xlu1 %1110  ;;  %v2171_v36 = vor.u32 %v2287_v20, %v2168_v28  ;;  %v3094_v27 = vpop.permute.xlu2 %1185 }
 0x148   : > { %v2143_v52 = vor.u32 %v2282_v51, %v2142_v34  ;;  %3522 = vst [vmem:[#allocation18_spill] sm:$0xff] %v3094_v27  ;;  %v2290_v45 = vld [vmem:[%s3460_s3 + $0x64] sm:$0xf0]  ;;  %v2293_v34 = vld [vmem:[%s3460_s3 + $0x84] sm:$0xf] }
 0x149   : > { %v922_v37 = vmax.f32 %v851_v4, 0.0  ;;  %1548 = vmatpush.bf16.msrb.mxu0 %v948_v29  ;;  %v965_v48 = vpack.c.bf16 %v921_v54, %v919_v1  ;;  %v2289_v1 = vld [vmem:[%s3460_s3 + $0x64] sm:$0xf]  ;;  %v2176_v54 = vld [vmem:[%s3460_s3 + $0x68] sm:$0xf0] }
 0x14a   : > { %1371 = vmatmul.bf16.vlgmr.msrb.gmra.mxu2 %v2127_v12  ;;  %v2179_v5 = vor.u32 %v2289_v1, %v2176_v54  ;;  %v2192_v51 = vld [vmem:[%s3460_s3 + $0x88] sm:$0xf0] }
 0x14b   : > { %1458 = vmatpush.bf16.msrb.mxu3 %v965_v48  ;;  %v966_v59 = vpack.c.bf16 %v922_v37, %v920_v30  ;;  %v2182_v37 = vld [vmem:[%s3460_s3 + $0x70] sm:$0xf]  ;;  %v2292_v48 = vld [vmem:[%s3460_s3 + $0x74] sm:$0xf0]  ;;  %v2195_v13 = vor.u32 %v2293_v34, %v2192_v51  ;;  %v2206_v51 = vld [vmem:[%s3460_s3 + $0xa0] sm:$0xf] }
 0x14c   : > { %1549 = vmatmul.bf16.vlgmr.msrb.gmra.mxu0 %v2127_v12  ;;  %v2175_v12 = vor.u32 %v2290_v45, %v2174_v0  ;;  %v2183_v49 = vor.u32 %v2292_v48, %v2182_v37  ;;  %v2200_v0 = vld [vmem:[%s3460_s3 + $0x98] sm:$0xf0] }
 0x14d   : > { %1636 = vmatpush.bf16.msrb.mxu1 %v966_v59  ;;  %v3062_v25 = vpop.permute.xlu0 %1190 }
 0x14e   : > { %3518 = vst [vmem:[#allocation23_spill] sm:$0xff] %v3062_v25 }
 0x14f   : > { %1459 = vmatpush.bf16.msrb.mxu3 %v963_v23  ;;  %v3072_v26 = vpop.permute.xlu1 %1095  ;;  %v3112_v4 = vpop.permute.xlu2 %1100  ;;  %v2187_v23 = vor.u32 %v2291_v53, %v2184_v14 }
 0x151   : > { %1637 = vmatpush.bf16.msrb.mxu1 %v964_v62 }
 0x152   : > { %1460 = vmatmul.bf16.vlgmr.msrb.gmra.mxu3 %v2131_v56 }
 0x154   : > { %1638 = vmatmul.bf16.vlgmr.msrb.gmra.mxu1 %v2131_v56 }
 0x155   : > { %v3074_v55 = vpop.permute.xlu0 %1175 }
 0x156   : > { %3519 = vst [vmem:[#allocation24_spill] sm:$0xff] %v3074_v55 }
 0x157   : > { %v3084_v35 = vpop.permute.xlu1 %1180  ;;  %v3124_v58 = vpop.permute.xlu2 %1085 }
 0x158   : > { %3521 = vst [vmem:[#allocation25_spill] sm:$0xff] %v3084_v35 }
 0x15a   : > { %1376 = vmatmul.bf16.gmra.mxu2 %v2135_v3 }
 0x15c   : > { %1554 = vmatmul.bf16.gmra.mxu0 %v2135_v3 }
 0x15d   : > { %v3092_v7 = vpop.permute.xlu0 %1090 }
 0x15f   : > { %v3102_v29 = vpop.permute.xlu1 %1165  ;;  %v3136_v56 = vpop.permute.xlu2 %1170 }
 0x160   : > { %3523 = vst [vmem:[#allocation19_spill] sm:$0xff] %v3102_v29 }
 0x161   : > { %3524 = vst [vmem:[#allocation21_spill] sm:$0xff] %v3136_v56 }
 0x162   : > { %1465 = vmatmul.bf16.gmra.mxu3 %v2139_v38 }
 0x164   : > { %1643 = vmatmul.bf16.gmra.mxu1 %v2139_v38 }
 0x165   : > { %v3104_v57 = vpop.permute.xlu0 %1075 }
 0x167   : > { %v3114_v60 = vpop.permute.xlu1 %1080  ;;  %v3148_v38 = vpop.permute.xlu2 %1155 }
 0x16a   : > { %1381 = vmatmul.bf16.gmra.mxu2 %v2143_v52 }
 0x16c   : > { %1559 = vmatmul.bf16.gmra.mxu0 %v2143_v52 }
 0x16d   : > { %v3116_v30 = vpop.permute.xlu0 %1160 }
 0x16f   : > { %v3126_v59 = vpop.permute.xlu1 %1065  ;;  %v3164_v44 = vpop.permute.xlu2 %1070 }
 0x172   : > { %1470 = vmatmul.bf16.gmra.mxu3 %v2147_v21 }
 0x174   : > { %1648 = vmatmul.bf16.gmra.mxu1 %v2147_v21 }
 0x175   : > { %v3128_v8 = vpop.permute.xlu0 %1145 }
 0x177   : > { %v3138_v62 = vpop.permute.xlu1 %1150  ;;  %v1056_v53 = vpop.permute.xlu2 %1055 }
 0x17a   : > { %1386 = vmatmul.bf16.gmra.mxu2 %v2151_v16 }
 0x17c   : > { %1564 = vmatmul.bf16.gmra.mxu0 %v2151_v16 }
 0x17d   : > { %v3146_v3 = vpop.permute.xlu0 %1060 }
 0x17f   : > { %v3156_v52 = vpop.permute.xlu1 %1135 }
 0x182   : > { %1475 = vmatmul.bf16.gmra.mxu3 %v2155_v17 }
 0x184   : > { %1653 = vmatmul.bf16.gmra.mxu1 %v2155_v17  ;;  %v2296_v17 = vld [vmem:[%s3460_s3 + $0x94] sm:$0xf0] }
 0x185   : > { %v1046_v21 = vpop.permute.xlu0 %1045 }
 0x187   : > { %v1051_v50 = vpop.permute.xlu1 %1050 }
 0x18a   : > { %1391 = vmatmul.bf16.gmra.mxu2 %v2159_v31 }
 0x18c   : > { %1569 = vmatmul.bf16.gmra.mxu0 %v2159_v31 }
 0x192   : > { %1480 = vmatmul.bf16.gmra.mxu3 %v2163_v47 }
 0x194   : > { %1658 = vmatmul.bf16.gmra.mxu1 %v2163_v47  ;;  %v2199_v47 = vor.u32 %v2296_v17, %v2198_v15 }
 0x19a   : > { %1396 = vmatmul.bf16.gmra.mxu2 %v2167_v33 }
 0x19c   : > { %1574 = vmatmul.bf16.gmra.mxu0 %v2167_v33 }
 0x1a2   : > { %1485 = vmatmul.bf16.gmra.mxu3 %v2171_v36 }
 0x1a4   : > { %1663 = vmatmul.bf16.gmra.mxu1 %v2171_v36  ;;  %v2295_v36 = vld [vmem:[%s3460_s3 + $0x94] sm:$0xf] }
 0x1a5   : > { %v2203_v48 = vor.u32 %v2295_v36, %v2200_v0 }
 0x1aa   : > { %1401 = vmatmul.bf16.gmra.mxu2 %v2175_v12 }
 0x1ac   : > { %1579 = vmatmul.bf16.gmra.mxu0 %v2175_v12 }
 0x1b2   : > { %1490 = vmatmul.bf16.gmra.mxu3 %v2179_v5 }
 0x1b4   : > { %1668 = vmatmul.bf16.gmra.mxu1 %v2179_v5 }
 0x1ba   : > { %1406 = vmatmul.bf16.gmra.mxu2 %v2183_v49 }
 0x1bc   : > { %1584 = vmatmul.bf16.gmra.mxu0 %v2183_v49 }
 0x1c2   : > { %1495 = vmatmul.bf16.gmra.mxu3 %v2187_v23 }
 0x1c4   : > { %1673 = vmatmul.bf16.gmra.mxu1 %v2187_v23 }
 0x1c9   : > { %v1550_v2 = vpop.f32.mrf.mxu0 }
 0x1ca   : > { %1411 = vmatmul.bf16.gmra.mxu2 %v2191_v46  ;;  %v1551_v19 = vadd.f32 %v1550_v2, %v1046_v21 }
 0x1cc   : > { %1589 = vmatmul.bf16.gmra.mxu0 %v2191_v46 }
 0x1cd   : > { %v1372_v10 = vpop.f32.mrf.mxu2 }
 0x1ce   : > { %v1373_v6 = vadd.f32 %v1372_v10, %v1046_v21  ;;  %v2298_v10 = vld [vmem:[%s3460_s3 + $0xa4] sm:$0xf0] }
 0x1d1   : > { %v1552_v40 = vpop.f32.mrf.mxu0  ;;  %v1639_v16 = vpop.f32.mrf.mxu1 }
 0x1d2   : > { %v1640_v61 = vadd.f32 %v1639_v16, %v1551_v19  ;;  %1500 = vmatmul.bf16.gmra.mxu3 %v2195_v13  ;;  %v1553_v18 = vadd.f32 %v1552_v40, %v1051_v50  ;;  %v2207_v16 = vor.u32 %v2298_v10, %v2206_v51 }
 0x1d4   : > { %1678 = vmatmul.bf16.gmra.mxu1 %v2195_v13  ;;  %v1720_v45 = vmax.f32 %v1640_v61, 0.0 }
 0x1d5   : > { %v1374_v31 = vpop.f32.mrf.mxu2  ;;  %v1461_v9 = vpop.f32.mrf.mxu3 }
 0x1d6   : > { %v1462_v32 = vadd.f32 %v1461_v9, %v1373_v6  ;;  %v1375_v12 = vadd.f32 %v1374_v31, %v1051_v50  ;;  %v2297_v31 = vld [vmem:[%s3460_s3 + $0xa4] sm:$0xf]  ;;  %v2208_v9 = vld [vmem:[%s3460_s3 + $0xa8] sm:$0xf0] }
 0x1d8   : > { %v1719_v14 = vmax.f32 %v1462_v32, 0.0 }
 0x1d9   : > { %v1555_v33 = vpop.f32.mrf.mxu0  ;;  %v1641_v20 = vpop.f32.mrf.mxu1 }
 0x1da   : > { %v1642_v28 = vadd.f32 %v1641_v20, %v1553_v18  ;;  %1416 = vmatmul.bf16.gmra.mxu2 %v2199_v47  ;;  %v1556_v23 = vadd.f32 %v1555_v33, %v1056_v53 }
 0x1dc   : > { %v1722_v1 = vmax.f32 %v1642_v28, 0.0  ;;  %1594 = vmatmul.bf16.gmra.mxu0 %v2199_v47  ;;  %v2211_v28 = vor.u32 %v2297_v31, %v2208_v9 }
 0x1dd   : > { %v1377_v54 = vpop.f32.mrf.mxu2  ;;  %v1463_v5 = vpop.f32.mrf.mxu3 }
 0x1de   : > { %v1464_v37 = vadd.f32 %v1463_v5, %v1375_v12  ;;  %v3172_v49 = vpack.c.bf16 %v1722_v1, %v1720_v45  ;;  %v1378_v13 = vadd.f32 %v1377_v54, %v1056_v53 }
 0x1e0   : > { %v1721_v63 = vmax.f32 %v1464_v37, 0.0 }
 0x1e1   : > { %v1557_v43 = vpop.f32.mrf.mxu0  ;;  %v1644_v46 = vpop.f32.mrf.mxu1 }
 0x1e2   : > { %v1645_v2 = vadd.f32 %v1644_v46, %v1556_v23  ;;  %1505 = vmatmul.bf16.gmra.mxu3 %v2203_v48  ;;  %v3174_v34 = vpack.c.bf16 %v1721_v63, %v1719_v14  ;;  %v1558_v61 = vadd.f32 %v1557_v43, %v3146_v3 }
 0x1e4   : > { %1683 = vmatmul.bf16.gmra.mxu1 %v2203_v48  ;;  %v1724_v32 = vmax.f32 %v1645_v2, 0.0  ;;  %v2300_v48 = vld [vmem:[%s3460_s3 + $0xb4] sm:$0xf0] }
 0x1e5   : > { %v1379_v21 = vpop.f32.mrf.mxu2  ;;  %v1466_v19 = vpop.f32.mrf.mxu3 }
 0x1e6   : > { %v1467_v40 = vadd.f32 %v1466_v19, %v1378_v13  ;;  %v1380_v47 = vadd.f32 %v1379_v21, %v3146_v3  ;;  %v2214_v3 = vld [vmem:[%s3460_s3 + $0xb0] sm:$0xf]  ;;  %v2299_v13 = vld [vmem:[%s3460_s3 + $0xb4] sm:$0xf]  ;;  %v2216_v21 = vld [vmem:[%s3460_s3 + $0xb8] sm:$0xf0] }
 0x1e7   : > { %v2215_v43 = vor.u32 %v2300_v48, %v2214_v3 }
 0x1e8   : > { %v1723_v0 = vmax.f32 %v1467_v40, 0.0 }
 0x1e9   : > { %v1560_v15 = vpop.f32.mrf.mxu0  ;;  %v1646_v17 = vpop.f32.mrf.mxu1 }
 0x1ea   : > { %v1647_v6 = vadd.f32 %v1646_v17, %v1558_v61  ;;  %1421 = vmatmul.bf16.gmra.mxu2 %v2207_v16  ;;  %v1561_v45 = vadd.f32 %v1560_v15, %v3126_v59  ;;  %v2219_v17 = vor.u32 %v2299_v13, %v2216_v21 }
 0x1ec   : > { %v1726_v50 = vmax.f32 %v1647_v6, 0.0  ;;  %1599 = vmatmul.bf16.gmra.mxu0 %v2207_v16 }
 0x1ed   : > { %v1382_v18 = vpop.f32.mrf.mxu2  ;;  %v1468_v33 = vpop.f32.mrf.mxu3 }
 0x1ee   : > { %v1469_v20 = vadd.f32 %v1468_v33, %v1380_v47  ;;  %v3190_v36 = vpack.c.bf16 %v1726_v50, %v1724_v32  ;;  %v1383_v53 = vadd.f32 %v1382_v18, %v3126_v59 }
 0x1f0   : > { %v1725_v12 = vmax.f32 %v1469_v20, 0.0  ;;  %v2302_v20 = vld [vmem:[%s3460_s3 + $0xc4] sm:$0xf0] }
 0x1f1   : > { %v1562_v1 = vpop.f32.mrf.mxu0  ;;  %v1649_v54 = vpop.f32.mrf.mxu1 }
 0x1f2   : > { %v1650_v5 = vadd.f32 %v1649_v54, %v1561_v45  ;;  %1510 = vmatmul.bf16.gmra.mxu3 %v2211_v28  ;;  %v3193_v37 = vpack.c.bf16 %v1725_v12, %v1723_v0  ;;  %v1563_v46 = vadd.f32 %v1562_v1, %v3164_v44 }
 0x1f4   : > { %1688 = vmatmul.bf16.gmra.mxu1 %v2211_v28  ;;  %v1728_v59 = vmax.f32 %v1650_v5, 0.0 }
 0x1f5   : > { %v1384_v14 = vpop.f32.mrf.mxu2  ;;  %v1471_v23 = vpop.f32.mrf.mxu3 }
 0x1f6   : > { %v1472_v63 = vadd.f32 %v1471_v23, %v1383_v53  ;;  %v1385_v19 = vadd.f32 %v1384_v14, %v3164_v44  ;;  %v2222_v44 = vld [vmem:[%s3460_s3 + $0xc0] sm:$0xf]  ;;  %v2301_v53 = vld [vmem:[%s3460_s3 + $0xc4] sm:$0xf]  ;;  %v2224_v14 = vld [vmem:[%s3460_s3 + $0xc8] sm:$0xf0] }
 0x1f7   : > { %v2223_v1 = vor.u32 %v2302_v20, %v2222_v44  ;;  %v2303_v44 = vld [vmem:[%s3460_s3 + $0xd4] sm:$0xf] }
 0x1f8   : > { %v1727_v31 = vmax.f32 %v1472_v63, 0.0 }
 0x1f9   : > { %v1565_v2 = vpop.f32.mrf.mxu0  ;;  %v1651_v51 = vpop.f32.mrf.mxu1 }
 0x1fa   : > { %v1652_v10 = vadd.f32 %v1651_v51, %v1563_v46  ;;  %1426 = vmatmul.bf16.gmra.mxu2 %v2215_v43  ;;  %v1566_v9 = vadd.f32 %v1565_v2, %v3104_v57  ;;  %v2227_v51 = vor.u32 %v2301_v53, %v2224_v14 }
 0x1fc   : > { %v1730_v40 = vmax.f32 %v1652_v10, 0.0  ;;  %1604 = vmatmul.bf16.gmra.mxu0 %v2215_v43 }
 0x1fd   : > { %v1387_v16 = vpop.f32.mrf.mxu2  ;;  %v1473_v61 = vpop.f32.mrf.mxu3 }
 0x1fe   : > { %v1474_v15 = vadd.f32 %v1473_v61, %v1385_v19  ;;  %v3210_v6 = vpack.c.bf16 %v1730_v40, %v1728_v59  ;;  %v1388_v28 = vadd.f32 %v1387_v16, %v3104_v57 }
 0x200   : > { %v1729_v32 = vmax.f32 %v1474_v15, 0.0  ;;  %v2304_v15 = vld [vmem:[%s3460_s3 + $0xd4] sm:$0xf0] }
 0x201   : > { %v1567_v47 = vpop.f32.mrf.mxu0  ;;  %v1654_v50 = vpop.f32.mrf.mxu1 }
 0x202   : > { %v1655_v18 = vadd.f32 %v1654_v50, %v1566_v9  ;;  %1515 = vmatmul.bf16.gmra.mxu3 %v2219_v17  ;;  %v3213_v33 = vpack.c.bf16 %v1729_v32, %v1727_v31  ;;  %v1568_v54 = vadd.f32 %v1567_v47, %v3114_v60 }
 0x204   : > { %1693 = vmatmul.bf16.gmra.mxu1 %v2219_v17  ;;  %v1732_v57 = vmax.f32 %v1655_v18, 0.0 }
 0x205   : > { %v1389_v0 = vpop.f32.mrf.mxu2  ;;  %v1476_v45 = vpop.f32.mrf.mxu3 }
 0x206   : > { %v1477_v12 = vadd.f32 %v1476_v45, %v1388_v28  ;;  %v1390_v23 = vadd.f32 %v1389_v0, %v3114_v60  ;;  %v2230_v60 = vld [vmem:[%s3460_s3 + $0xd0] sm:$0xf] }
 0x207   : > { %v2231_v47 = vor.u32 %v2304_v15, %v2230_v60 }
 0x208   : > { %v1731_v13 = vmax.f32 %v1477_v12, 0.0 }
 0x209   : > { %v1570_v5 = vpop.f32.mrf.mxu0  ;;  %v1656_v3 = vpop.f32.mrf.mxu1 }
 0x20a   : > { %v1657_v48 = vadd.f32 %v1656_v3, %v1568_v54  ;;  %1431 = vmatmul.bf16.gmra.mxu2 %v2223_v1  ;;  %v1571_v21 = vadd.f32 %v1570_v5, %v3124_v58  ;;  %v2306_v54 = vld [vmem:[%s3460_s3 + $0xe4] sm:$0xf0] }
 0x20c   : > { %v1734_v63 = vmax.f32 %v1657_v48, 0.0  ;;  %1609 = vmatmul.bf16.gmra.mxu0 %v2223_v1  ;;  %v2238_v1 = vld [vmem:[%s3460_s3 + $0xe0] sm:$0xf] }
 0x20d   : > { %v1392_v43 = vpop.f32.mrf.mxu2  ;;  %v1478_v46 = vpop.f32.mrf.mxu3  ;;  %v2239_v48 = vor.u32 %v2306_v54, %v2238_v1  ;;  %v2248_v1 = vld [vmem:[%s3460_s3 + $0xf8] sm:$0xf0] }
 0x20e   : > { %v1479_v2 = vadd.f32 %v1478_v46, %v1390_v23  ;;  %v3230_v10 = vpack.c.bf16 %v1734_v63, %v1732_v57  ;;  %v1393_v17 = vadd.f32 %v1392_v43, %v3124_v58  ;;  %v2232_v58 = vld [vmem:[%s3460_s3 + $0xd8] sm:$0xf0]  ;;  %v2305_v57 = vld [vmem:[%s3460_s3 + $0xe4] sm:$0xf]  ;;  %v2240_v23 = vld [vmem:[%s3460_s3 + $0xe8] sm:$0xf0] }
 0x20f   : > { %v2235_v0 = vor.u32 %v2303_v44, %v2232_v58  ;;  %v2243_v46 = vor.u32 %v2305_v57, %v2240_v23 }
 0x210   : > { %v1733_v59 = vmax.f32 %v1479_v2, 0.0 }
 0x211   : > { %v3233_v19 = vpop.f32.mrf.mxu0  ;;  %v1659_v40 = vpop.f32.mrf.mxu1 }
 0x212   : > { %v3235_v16 = vadd.f32 %v1659_v40, %v1571_v21  ;;  %1520 = vmatmul.bf16.gmra.mxu3 %v2227_v51  ;;  %v3237_v61 = vpack.c.bf16 %v1733_v59, %v1731_v13  ;;  %v2246_v13 = vld [vmem:[%s3460_s3 + $0xf0] sm:$0xf]  ;;  %v2308_v21 = vld [vmem:[%s3460_s3 + $0xf4] sm:$0xf0] }
 0x213   : > { %v2247_v15 = vor.u32 %v2308_v21, %v2246_v13  ;;  %v3306_v13 = vpop.permute.xlu2 %1140 }
 0x214   : > { %1698 = vmatmul.bf16.gmra.mxu1 %v2227_v51 }
 0x215   : > { %v3246_v31 = vpop.f32.mrf.mxu2  ;;  %v1481_v9 = vpop.f32.mrf.mxu3 }
 0x216   : > { %v3248_v32 = vadd.f32 %v1481_v9, %v1393_v17 }
 0x219   : > { %v3250_v50 = vpop.f32.mrf.mxu0  ;;  %v3252_v18 = vpop.f32.mrf.mxu1 }
 0x21a   : > { %1436 = vmatmul.bf16.gmra.mxu2 %v2231_v47 }
 0x21b   : > { %v1126_v35 = vpop.permute.xlu2 %1125 }
 0x21c   : > { %1614 = vmatmul.bf16.gmra.mxu0 %v2231_v47 }
 0x21d   : > { %v3260_v20 = vpop.f32.mrf.mxu2  ;;  %v3262_v28 = vpop.f32.mrf.mxu3 }
 0x221   : > { %v3264_v45 = vpop.f32.mrf.mxu0  ;;  %v3266_v12 = vpop.f32.mrf.mxu1 }
 0x222   : > { %1525 = vmatmul.bf16.gmra.mxu3 %v2235_v0 }
 0x224   : > { %1703 = vmatmul.bf16.gmra.mxu1 %v2235_v0  ;;  %v2307_v0 = vld [vmem:[%s3460_s3 + $0xf4] sm:$0xf] }
 0x225   : > { %v1399_v5 = vpop.f32.mrf.mxu2  ;;  %v3274_v3 = vpop.f32.mrf.mxu3 }
 0x229   : > { %v1580_v53 = vpop.f32.mrf.mxu0  ;;  %v3276_v14 = vpop.f32.mrf.mxu1 }
 0x22a   : > { %1441 = vmatmul.bf16.gmra.mxu2 %v2239_v48  ;;  %v1581_v60 = vadd.f32 %v1580_v53, %v3052_v42 }
 0x22c   : > { %1619 = vmatmul.bf16.gmra.mxu0 %v2239_v48 }
 0x22d   : > { %v1402_v63 = vpop.f32.mrf.mxu2  ;;  %v1488_v43 = vpop.f32.mrf.mxu3 }
 0x231   : > { %v1582_v2 = vpop.f32.mrf.mxu0  ;;  %v1669_v51 = vpop.f32.mrf.mxu1 }
 0x232   : > { %1530 = vmatmul.bf16.gmra.mxu3 %v2243_v46  ;;  %v1583_v17 = vadd.f32 %v1582_v2, %v3060_v24  ;;  %v1670_v9 = vadd.f32 %v1669_v51, %v1581_v60 }
 0x234   : > { %1708 = vmatmul.bf16.gmra.mxu1 %v2243_v46  ;;  %v1744_v54 = vmax.f32 %v1670_v9, 0.0  ;;  %v2251_v46 = vor.u32 %v2307_v0, %v2248_v1 }
 0x235   : > { %v1404_v59 = vpop.f32.mrf.mxu2  ;;  %v1491_v40 = vpop.f32.mrf.mxu3 }
 0x236   : > { %v1405_v9 = vadd.f32 %v1404_v59, %v3060_v24 }
 0x239   : > { %v3292_v47 = vpop.f32.mrf.mxu0  ;;  %v1671_v44 = vpop.f32.mrf.mxu1 }
 0x23a   : > { %v1672_v58 = vadd.f32 %v1671_v44, %v1583_v17  ;;  %1446 = vmatmul.bf16.gmra.mxu2 %v2247_v15 }
 0x23c   : > { %v1746_v48 = vmax.f32 %v1672_v58, 0.0  ;;  %1624 = vmatmul.bf16.gmra.mxu0 %v2247_v15 }
 0x23d   : > { %v1407_v53 = vpop.f32.mrf.mxu2  ;;  %v1493_v57 = vpop.f32.mrf.mxu3 }
 0x23e   : > { %v3300_v23 = vpack.c.bf16 %v1746_v48, %v1744_v54  ;;  %v1408_v15 = vadd.f32 %v1407_v53, %v3070_v41  ;;  %v1403_v48 = vadd.f32 %v1402_v63, %v3052_v42  ;;  %v1494_v56 = vadd.f32 %v1493_v57, %v1405_v9 }
 0x23f   : > { %v1398_v53 = vadd.f32 %v3260_v20, %v3072_v26  ;;  %v1395_v42 = vadd.f32 %v3246_v31, %v3092_v7 }
 0x240   : > { %v1492_v27 = vadd.f32 %v1491_v40, %v1403_v48 }
 0x241   : > { %v3302_v2 = vpop.f32.mrf.mxu0  ;;  %v3304_v51 = vpop.f32.mrf.mxu1  ;;  %v1487_v63 = vadd.f32 %v3274_v3, %v1398_v53 }
 0x242   : > { %1535 = vmatmul.bf16.gmra.mxu3 %v2251_v46  ;;  %v1743_v57 = vmax.f32 %v1492_v27, 0.0  ;;  %v1735_v27 = vmax.f32 %v3248_v32, 0.0 }
 0x244   : > { %1713 = vmatmul.bf16.gmra.mxu1 %v2251_v46  ;;  %v1400_v46 = vadd.f32 %v1399_v5, %v3112_v4 }
 0x245   : > { %v1409_v21 = vpop.f32.mrf.mxu2  ;;  %v1496_v60 = vpop.f32.mrf.mxu3 }
 0x246   : > { %v1410_v58 = vadd.f32 %v1409_v21, %v3042_v22  ;;  %v1497_v0 = vadd.f32 %v1496_v60, %v1408_v15  ;;  %v1489_v21 = vadd.f32 %v1488_v43, %v1400_v46  ;;  %v1745_v60 = vmax.f32 %v1494_v56, 0.0 }
 0x247   : > { %v1739_v43 = vmax.f32 %v1487_v63, 0.0 }
 0x248   : > { %v1747_v39 = vmax.f32 %v1497_v0, 0.0  ;;  %v1741_v9 = vmax.f32 %v1489_v21, 0.0  ;;  %v1795_v20 = vpack.c.bf16 %v1745_v60, %v1743_v57  ;;  %v1131_v0 = vpop.permute.xlu0 %1130  ;;  %v1588_v57 = vadd.f32 %v3302_v2, %v3042_v22 }
 0x249   : > { %v1590_v17 = vpop.f32.mrf.mxu0  ;;  %v3308_v44 = vpop.f32.mrf.mxu1 }
 0x24a   : > { %v1591_v25 = vadd.f32 %v1590_v17, %v1126_v35 }
 0x24d   : > { %v1412_v1 = vpop.f32.mrf.mxu2  ;;  %v1498_v54 = vpop.f32.mrf.mxu3 }
 0x24e   : > { %v1499_v55 = vadd.f32 %v1498_v54, %v1410_v58  ;;  %v1413_v5 = vadd.f32 %v1412_v1, %v1126_v35  ;;  %v1793_v54 = vpack.c.bf16 %v1741_v9, %v1739_v43  ;;  %v1677_v9 = vadd.f32 %v3308_v44, %v1588_v57 }
 0x250   : > { %v1749_v11 = vmax.f32 %v1499_v55, 0.0  ;;  %v1484_v55 = vadd.f32 %v3262_v28, %v1395_v42 }
 0x251   : > { %v1592_v24 = vpop.f32.mrf.mxu0  ;;  %v1679_v59 = vpop.f32.mrf.mxu1 }
 0x252   : > { %v1797_v15 = vpack.c.bf16 %v1749_v11, %v1747_v39  ;;  %v1680_v29 = vadd.f32 %v1679_v59, %v1591_v25  ;;  %v1593_v56 = vadd.f32 %v1592_v24, %v1131_v0  ;;  %v1737_v39 = vmax.f32 %v1484_v55, 0.0 }
 0x253   : > { %v1586_v55 = vadd.f32 %v3292_v47, %v3070_v41 }
 0x254   : > { %1829 = vmatpush.bf16.msra.mxu2 %v1797_v15  ;;  %v1752_v35 = vmax.f32 %v1680_v29, 0.0  ;;  %v1791_v59 = vpack.c.bf16 %v1737_v39, %v1735_v27 }
 0x255   : > { %v1414_v40 = vpop.f32.mrf.mxu2  ;;  %v1501_v17 = vpop.f32.mrf.mxu3 }
 0x256   : > { %v1502_v58 = vadd.f32 %v1501_v17, %v1413_v5  ;;  %v1415_v3 = vadd.f32 %v1414_v40, %v1131_v0  ;;  %v1750_v0 = vmax.f32 %v1677_v9, 0.0 }
 0x258   : > { %1830 = vmatpush.bf16.msra.mxu2 %v1795_v20  ;;  %v1751_v21 = vmax.f32 %v1502_v58, 0.0 }
 0x259   : > { %v1595_v11 = vpop.f32.mrf.mxu0  ;;  %v1681_v25 = vpop.f32.mrf.mxu1 }
 0x25a   : > { %v1682_v31 = vadd.f32 %v1681_v25, %v1593_v56  ;;  %v1596_v24 = vadd.f32 %v1595_v11, %v3156_v52 }
 0x25c   : > { %v1754_v1 = vmax.f32 %v1682_v31, 0.0  ;;  %1831 = vmatpush.bf16.msra.mxu2 %v1793_v54  ;;  %v1576_v31 = vadd.f32 %v3250_v50, %v3072_v26 }
 0x25d   : > { %v1417_v48 = vpop.f32.mrf.mxu2  ;;  %v1503_v28 = vpop.f32.mrf.mxu3 }
 0x25e   : > { %v3322_v46 = vpack.c.bf16 %v1754_v1, %v1752_v35  ;;  %v1504_v53 = vadd.f32 %v1503_v28, %v1415_v3  ;;  %v1418_v29 = vadd.f32 %v1417_v48, %v3156_v52  ;;  %v3339_v52 = vld [vmem:[%s3462_s5] sm:$0xff] }
 0x25f   : > { %v1823_v43 = vunpack.c.l.b16 %v3339_v52 }
 0x260   : > { %v1753_v60 = vmax.f32 %v1504_v53, 0.0  ;;  %1832 = vmatpush.bf16.msra.mxu2 %v1791_v59 }
 0x261   : > { %v1597_v15 = vpop.f32.mrf.mxu0  ;;  %v1684_v42 = vpop.f32.mrf.mxu1  ;;  %v3352_v35 = vpack.c.b16 %v1823_v43, %v1823_v43 }
 0x262   : > { %v3325_v63 = vpack.c.bf16 %v1753_v60, %v1751_v21  ;;  %v1685_v32 = vadd.f32 %v1684_v42, %v1596_v24  ;;  %v1598_v20 = vadd.f32 %v1597_v15, %v3306_v13  ;;  %v1736_v60 = vmax.f32 %v3235_v16, 0.0 }
 0x264   : > { %1833 = vmatpush.bf16.msra.mxu2 %v3237_v61  ;;  %v1675_v61 = vadd.f32 %v3304_v51, %v1586_v55  ;;  %v1756_v41 = vmax.f32 %v1685_v32, 0.0 }
 0x265   : > { %v1419_v5 = vpop.f32.mrf.mxu2  ;;  %v1506_v40 = vpop.f32.mrf.mxu3 }
 0x266   : > { %v1507_v17 = vadd.f32 %v1506_v40, %v1418_v29  ;;  %v1420_v47 = vadd.f32 %v1419_v5, %v3306_v13  ;;  %v1748_v56 = vmax.f32 %v1675_v61, 0.0 }
 0x268   : > { %1834 = vmatpush.bf16.msra.mxu2 %v3213_v33  ;;  %v1578_v33 = vadd.f32 %v3264_v45, %v3112_v4  ;;  %v1798_v27 = vpack.c.bf16 %v1750_v0, %v1748_v56  ;;  %v1755_v13 = vmax.f32 %v1507_v17, 0.0  ;;  %v1573_v4 = vadd.f32 %v3233_v19, %v3092_v7 }
 0x269   : > { %v1600_v22 = vpop.f32.mrf.mxu0  ;;  %v1686_v2 = vpop.f32.mrf.mxu1  ;;  %v1665_v45 = vadd.f32 %v3266_v12, %v1576_v31 }
 0x26a   : > { %v1687_v58 = vadd.f32 %v1686_v2, %v1598_v20  ;;  %v1667_v54 = vadd.f32 %v3276_v14, %v1578_v33  ;;  %v1662_v14 = vadd.f32 %v3252_v18, %v1573_v4 }
 0x26b   : > { %v1740_v59 = vmax.f32 %v1665_v45, 0.0 }
 0x26c   : > { %v1758_v44 = vmax.f32 %v1687_v58, 0.0  ;;  %1835 = vmatpush.bf16.msra.mxu2 %v3193_v37  ;;  %v1601_v37 = vadd.f32 %v1600_v22, %v3128_v8  ;;  %v1742_v28 = vmax.f32 %v1667_v54, 0.0  ;;  %v1738_v19 = vmax.f32 %v1662_v14, 0.0  ;;  %v3525_v54 = vld [vmem:[#allocation19_spill] sm:$0xff] }
 0x26d   : > { %v1422_v11 = vpop.f32.mrf.mxu2  ;;  %v1508_v25 = vpop.f32.mrf.mxu3 }
 0x26e   : > { %v3347_v39 = vpack.c.bf16 %v1758_v44, %v1756_v41  ;;  %v1509_v51 = vadd.f32 %v1508_v25, %v1420_v47  ;;  %v1423_v53 = vadd.f32 %v1422_v11, %v3128_v8  ;;  %v1794_v12 = vpack.c.bf16 %v1742_v28, %v1740_v59 }
 0x26f   : > { %v1792_v32 = vpack.c.bf16 %v1738_v19, %v1736_v60 }
 0x270   : > { %v1757_v3 = vmax.f32 %v1509_v51, 0.0  ;;  %1836 = vmatpush.bf16.msra.mxu2 %v3174_v34 }
 0x271   : > { %v1602_v1 = vpop.f32.mrf.mxu0  ;;  %v1689_v48 = vpop.f32.mrf.mxu1 }
 0x272   : > { %v3359_v26 = vpack.c.bf16 %v1757_v3, %v1755_v13  ;;  %v1690_v50 = vadd.f32 %v1689_v48, %v1601_v37  ;;  %v1603_v24 = vadd.f32 %v1602_v1, %v3138_v62 }
 0x273   : > { %1837 = vmatmul.bf16.vlgmr.msra.gmra.mxu2 %v3352_v35 }
 0x274   : > { %1855 = vmatpush.bf16.msrb.mxu2 %v1798_v27  ;;  %v1760_v29 = vmax.f32 %v1690_v50, 0.0 }
 0x275   : > { %v1424_v34 = vpop.f32.mrf.mxu2  ;;  %v1511_v21 = vpop.f32.mrf.mxu3 }
 0x276   : > { %v1512_v7 = vadd.f32 %v1511_v21, %v1423_v53  ;;  %v1425_v8 = vadd.f32 %v1424_v34, %v3138_v62 }
 0x278   : > { %1856 = vmatpush.bf16.msrb.mxu2 %v3300_v23  ;;  %v1759_v55 = vmax.f32 %v1512_v7, 0.0 }
 0x279   : > { %v1605_v15 = vpop.f32.mrf.mxu0  ;;  %v1691_v42 = vpop.f32.mrf.mxu1 }
 0x27a   : > { %v1692_v18 = vadd.f32 %v1691_v42, %v1603_v24  ;;  %v1606_v9 = vadd.f32 %v1605_v15, %v3148_v38 }
 0x27c   : > { %1857 = vmatpush.bf16.msrb.mxu2 %v1794_v12  ;;  %v1762_v57 = vmax.f32 %v1692_v18, 0.0 }
 0x27d   : > { %v1427_v5 = vpop.f32.mrf.mxu2  ;;  %v1513_v40 = vpop.f32.mrf.mxu3 }
 0x27e   : > { %v3368_v23 = vpack.c.bf16 %v1762_v57, %v1760_v29  ;;  %v1514_v17 = vadd.f32 %v1513_v40, %v1425_v8  ;;  %v1428_v62 = vadd.f32 %v1427_v5, %v3148_v38  ;;  %v3526_v8 = vld [vmem:[#allocation22_spill] sm:$0xff]  ;;  %v3527_v5 = vld [vmem:[#allocation23_spill] sm:$0xff] }
 0x280   : > { %1858 = vmatpush.bf16.msrb.mxu2 %v1792_v32  ;;  %v1761_v20 = vmax.f32 %v1514_v17, 0.0  ;;  %v3528_v17 = vld [vmem:[#allocation20_spill] sm:$0xff] }
 0x281   : > { %v1694_v16 = vpop.f32.mrf.mxu1  ;;  %v1607_v22 = vpop.f32.mrf.mxu0 }
 0x282   : > { %v3372_v61 = vpack.c.bf16 %v1761_v20, %v1759_v55  ;;  %v1695_v2 = vadd.f32 %v1694_v16, %v1606_v9  ;;  %v1608_v41 = vadd.f32 %v1607_v22, %v3116_v30  ;;  %v3529_v16 = vld [vmem:[#allocation18_spill] sm:$0xff] }
 0x284   : > { %1859 = vmatpush.bf16.msrb.mxu2 %v3230_v10  ;;  %v1764_v33 = vmax.f32 %v1695_v2, 0.0 }
 0x285   : > { %v1429_v58 = vpop.f32.mrf.mxu2  ;;  %v1516_v0 = vpop.f32.mrf.mxu3 }
 0x286   : > { %v1517_v43 = vadd.f32 %v1516_v0, %v1428_v62  ;;  %v1430_v10 = vadd.f32 %v1429_v58, %v3116_v30  ;;  %v3530_v0 = vld [vmem:[#allocation25_spill] sm:$0xff] }
 0x288   : > { %1860 = vmatpush.bf16.msrb.mxu2 %v3210_v6  ;;  %v1763_v6 = vmax.f32 %v1517_v43, 0.0 }
 0x289   : > { %v1696_v47 = vpop.f32.mrf.mxu1  ;;  %v1610_v56 = vpop.f32.mrf.mxu0 }
 0x28a   : > { %v1697_v44 = vadd.f32 %v1696_v47, %v1608_v41  ;;  %v1611_v27 = vadd.f32 %v1610_v56, %v3525_v54 }
 0x28c   : > { %1861 = vmatpush.bf16.msrb.mxu2 %v3190_v36  ;;  %v1766_v11 = vmax.f32 %v1697_v44, 0.0 }
 0x28d   : > { %v1432_v25 = vpop.f32.mrf.mxu2  ;;  %v1518_v51 = vpop.f32.mrf.mxu3 }
 0x28e   : > { %v3380_v38 = vpack.c.bf16 %v1766_v11, %v1764_v33  ;;  %v1519_v31 = vadd.f32 %v1518_v51, %v1430_v10  ;;  %v1433_v30 = vadd.f32 %v1432_v25, %v3525_v54  ;;  %v3531_v10 = vld [vmem:[#allocation24_spill] sm:$0xff] }
 0x290   : > { %1862 = vmatpush.bf16.msrb.mxu2 %v3172_v49  ;;  %v1765_v13 = vmax.f32 %v1519_v31, 0.0  ;;  %v3532_v31 = vld [vmem:[#allocation21_spill] sm:$0xff] }
 0x291   : > { %v1699_v36 = vpop.f32.mrf.mxu1  ;;  %v3387_v28 = vpop.f32.mrf.mxu0 }
 0x292   : > { %v1805_v37 = vpack.c.bf16 %v1765_v13, %v1763_v6  ;;  %v3384_v3 = vadd.f32 %v1699_v36, %v1611_v27 }
 0x293   : > { %1863 = vmatmul.bf16.vlgmr.msrb.gmra.mxu2 %v3352_v35 }
 0x295   : > { %v1434_v4 = vpop.f32.mrf.mxu2  ;;  %v1521_v45 = vpop.f32.mrf.mxu3 }
 0x296   : > { %v1522_v1 = vadd.f32 %v1521_v45, %v1433_v30  ;;  %v1435_v6 = vadd.f32 %v1434_v4, %v3532_v31 }
 0x299   : > { %v3389_v53 = vpop.f32.mrf.mxu1  ;;  %v3391_v35 = vpop.f32.mrf.mxu0 }
 0x29d   : > { %v1437_v48 = vpop.f32.mrf.mxu2  ;;  %v1523_v49 = vpop.f32.mrf.mxu3 }
 0x29e   : > { %v1438_v56 = vadd.f32 %v1437_v48, %v3531_v10  ;;  %v1524_v13 = vadd.f32 %v1523_v49, %v1435_v6 }
 0x2a1   : > { %v3393_v21 = vpop.f32.mrf.mxu1  ;;  %v1617_v12 = vpop.f32.mrf.mxu0 }
 0x2a5   : > { %v1439_v50 = vpop.f32.mrf.mxu2  ;;  %v1526_v14 = vpop.f32.mrf.mxu3 }
 0x2a6   : > { %v1440_v43 = vadd.f32 %v1439_v50, %v3530_v0  ;;  %v1527_v54 = vadd.f32 %v1526_v14, %v1438_v56  ;;  %v1769_v50 = vmax.f32 %v1524_v13, 0.0 }
 0x2a8   : > { %v1771_v45 = vmax.f32 %v1527_v54, 0.0 }
 0x2a9   : > { %v1706_v24 = vpop.f32.mrf.mxu1  ;;  %v1620_v42 = vpop.f32.mrf.mxu0 }
 0x2ad   : > { %v1442_v59 = vpop.f32.mrf.mxu2  ;;  %v1528_v34 = vpop.f32.mrf.mxu3 }
 0x2ae   : > { %v1443_v22 = vadd.f32 %v1442_v59, %v3529_v16  ;;  %v1529_v11 = vadd.f32 %v1528_v34, %v1440_v43 }
 0x2b0   : > { %v1773_v36 = vmax.f32 %v1529_v11, 0.0 }
 0x2b1   : > { %v1709_v32 = vpop.f32.mrf.mxu1  ;;  %v1622_v2 = vpop.f32.mrf.mxu0 }
 0x2b5   : > { %v1444_v7 = vpop.f32.mrf.mxu2  ;;  %v1531_v19 = vpop.f32.mrf.mxu3 }
 0x2b6   : > { %v1445_v40 = vadd.f32 %v1444_v7, %v3527_v5  ;;  %v1532_v41 = vadd.f32 %v1531_v19, %v1443_v22  ;;  %v1809_v7 = vpack.c.bf16 %v1773_v36, %v1771_v45 }
 0x2b8   : > { %v1775_v27 = vmax.f32 %v1532_v41, 0.0 }
 0x2b9   : > { %v1711_v47 = vpop.f32.mrf.mxu1  ;;  %v1625_v59 = vpop.f32.mrf.mxu0 }
 0x2ba   : > { %v1626_v14 = vadd.f32 %v1625_v59, %v3526_v8 }
 0x2bd   : > { %v1533_v60 = vpop.f32.mrf.mxu3  ;;  %v1447_v15 = vpop.f32.mrf.mxu2 }
 0x2be   : > { %v1448_v57 = vadd.f32 %v1447_v15, %v3526_v8  ;;  %v1534_v62 = vadd.f32 %v1533_v60, %v1445_v40  ;;  %v1767_v60 = vmax.f32 %v1522_v1, 0.0  ;;  %v1616_v8 = vadd.f32 %v3391_v35, %v3531_v10 }
 0x2c0   : > { %v1777_v25 = vmax.f32 %v1534_v62, 0.0  ;;  %v1807_v48 = vpack.c.bf16 %v1769_v50, %v1767_v60 }
 0x2c1   : > { %v1714_v19 = vpop.f32.mrf.mxu1  ;;  %v1627_v34 = vpop.f32.mrf.mxu0 }
 0x2c2   : > { %v1811_v30 = vpack.c.bf16 %v1777_v25, %v1775_v27  ;;  %v1628_v4 = vadd.f32 %v1627_v34, %v3528_v17 }
 0x2c5   : > { %v1536_v18 = vpop.f32.mrf.mxu3  ;;  %v1449_v29 = vpop.f32.mrf.mxu2 }
 0x2c6   : > { %v1450_v55 = vadd.f32 %v1449_v29, %v3528_v17  ;;  %v1537_v9 = vadd.f32 %v1536_v18, %v1448_v57  ;;  %v1623_v18 = vadd.f32 %v1622_v2, %v3527_v5  ;;  %v1715_v29 = vadd.f32 %v1714_v19, %v1626_v14 }
 0x2c7   : > { %v1621_v57 = vadd.f32 %v1620_v42, %v3529_v16  ;;  %v1613_v42 = vadd.f32 %v3387_v28, %v3532_v31 }
 0x2c8   : > { %v1779_v44 = vmax.f32 %v1537_v9, 0.0  ;;  %v1712_v40 = vadd.f32 %v1711_v47, %v1623_v18  ;;  %v1780_v17 = vmax.f32 %v1715_v29, 0.0 }
 0x2c9   : > { %v1716_v15 = vpop.f32.mrf.mxu1  ;;  %v1710_v9 = vadd.f32 %v1709_v32, %v1621_v57 }
 0x2ca   : > { %v1717_v49 = vadd.f32 %v1716_v15, %v1628_v4 }
 0x2cb   : > { %v1776_v16 = vmax.f32 %v1710_v9, 0.0 }
 0x2cc   : > { %v1782_v1 = vmax.f32 %v1717_v49, 0.0 }
 0x2cd   : > { %v1538_v20 = vpop.f32.mrf.mxu3 }
 0x2ce   : > { %v1539_v58 = vadd.f32 %v1538_v20, %v1450_v55  ;;  %v1824_v55 = vunpack.c.h.b16 %v3339_v52  ;;  %v1814_v22 = vpack.c.bf16 %v1782_v1, %v1780_v17  ;;  %v1705_v52 = vadd.f32 %v3393_v21, %v1616_v8 }
 0x2d0   : > { %v1781_v33 = vmax.f32 %v1539_v58, 0.0  ;;  %v1826_v5 = vpack.c.b16 %v1824_v55, %v1824_v55  ;;  %v1772_v2 = vmax.f32 %v1705_v52, 0.0  ;;  %v1768_v58 = vmax.f32 %v3384_v3, 0.0 }
 0x2d2   : > { %v1813_v51 = vpack.c.bf16 %v1781_v33, %v1779_v44 }
 0x2d4   : > { %1842 = vmatpush.bf16.msra.mxu3 %v1813_v51 }
 0x2d8   : > { %1843 = vmatpush.bf16.msra.mxu3 %v1811_v30 }
 0x2dc   : > { %1844 = vmatpush.bf16.msra.mxu3 %v1809_v7 }
 0x2e0   : > { %1845 = vmatpush.bf16.msra.mxu3 %v1807_v48 }
 0x2e4   : > { %1846 = vmatpush.bf16.msra.mxu3 %v1805_v37  ;;  %v1618_v37 = vadd.f32 %v1617_v12, %v3530_v0  ;;  %v1820_v0 = vpop.permute.xlu1 %1819 }
 0x2e6   : > { %v1707_v20 = vadd.f32 %v1706_v24, %v1618_v37 }
 0x2e8   : > { %1847 = vmatpush.bf16.msra.mxu3 %v3372_v61  ;;  %v1778_v61 = vmax.f32 %v1712_v40, 0.0  ;;  %v1774_v12 = vmax.f32 %v1707_v20, 0.0 }
 0x2ea   : > { %v1812_v32 = vpack.c.bf16 %v1778_v61, %v1776_v16  ;;  %v1810_v62 = vpack.c.bf16 %v1774_v12, %v1772_v2 }
 0x2ec   : > { %1848 = vmatpush.bf16.msra.mxu3 %v3359_v26  ;;  %v1702_v26 = vadd.f32 %v3389_v53, %v1613_v42 }
 0x2ee   : > { %v1770_v24 = vmax.f32 %v1702_v26, 0.0 }
 0x2f0   : > { %1849 = vmatpush.bf16.msra.mxu3 %v3325_v63  ;;  %v1808_v63 = vpack.c.bf16 %v1770_v24, %v1768_v58  ;;  %v1917_v58 = vlaneseq }
 0x2f2   : > { %vm1919_vm6 = vcmp.lt.s32.totalorder %v1917_v58, 256 }
 0x2f3   : > { %1850 = vmatmul.bf16.vlgmr.msra.gmra.mxu3 %v1826_v5 }
 0x2f4   : > { %1868 = vmatpush.bf16.msrb.mxu3 %v1814_v22 }
 0x2f6   : > { %v1838_v35 = vpop.f32.mrf.mxu2 }
 0x2f7   : > { %v1839_v43 = vadd.f32 %v1838_v35, %v1820_v0 }
 0x2f8   : > { %1869 = vmatpush.bf16.msrb.mxu3 %v1812_v32 }
 0x2fc   : > { %1870 = vmatpush.bf16.msrb.mxu3 %v1810_v62 }
 0x2fe   : > { %v1840_v28 = vpop.f32.mrf.mxu2 }
 0x300   : > { %1871 = vmatpush.bf16.msrb.mxu3 %v1808_v63 }
 0x304   : > { %1872 = vmatpush.bf16.msrb.mxu3 %v3380_v38 }
 0x308   : > { %1873 = vmatpush.bf16.msrb.mxu3 %v3368_v23 }
 0x30c   : > { %1874 = vmatpush.bf16.msrb.mxu3 %v3347_v39 }
 0x310   : > { %1875 = vmatpush.bf16.msrb.mxu3 %v3322_v46 }
 0x313   : > { %1876 = vmatmul.bf16.vlgmr.msrb.gmra.mxu3 %v1826_v5 }
 0x316   : > { %v1864_v53 = vpop.f32.mrf.mxu2 }
 0x317   : > { %v1865_v31 = vadd.f32 %v1864_v53, %v1820_v0 }
 0x31e   : > { %v1866_v21 = vpop.f32.mrf.mxu2 }
 0x376   : > { %v1851_v41 = vpop.f32.mrf.mxu3 }
 0x377   : > { %v1852_v47 = vadd.f32 %v1851_v41, %v1839_v43 }
 0x379   : > { %2388 = vtanh.f32 %v1852_v47 }
 0x37e   : > { %v1853_v3 = vpop.f32.mrf.mxu3 }
 0x37f   : > { %v2389_v44 = vpop.eup %2388 }
 0x380   : > { %v1883_v33 = vmul.f32 127.0, %v2389_v44 }
 0x382   : > { %v2315_v10 = vcvt.f32.s32 %v1883_v33  ;;  %v2313_v38 = vand.u32 2147483647, %v1883_v33  ;;  %v2318_v23 = vand.u32 2147483648, %v1883_v33 }
 0x384   : > { %v2316_v56 = vcvt.s32.f32 %v2315_v10  ;;  %vm2314_vm1 = vcmp.lt.f32.partialorder %v2313_v38, 8388608.0 }
 0x386   : > { %v2317_v11 = vand.u32 2147483647, %v2316_v56 }
 0x388   : > { %v2319_v25 = vor.u32 %v2318_v23, %v2317_v11 }
 0x38a   : > { %v2320_v39 = vsel %vm2314_vm1, %v2319_v25, %v1883_v33 }
 0x38b   : > { %v1887_v46 = vrot.slane %v2320_v39, 4 }
 0x38d   : > { %v1888_v51 = vadd.f32 %v2320_v39, %v1887_v46 }
 0x38f   : > { %v1889_v54 = vrot.slane %v1888_v51, 2 }
 0x391   : > { %v1890_v13 = vadd.f32 %v1889_v54, %v1888_v51 }
 0x393   : > { %v1891_v45 = vrot.slane %v1890_v13, 1 }
 0x395   : > { %v1892_v7 = vadd.f32 %v1891_v45, %v1890_v13 }
 0x396   : > { %v1877_v6 = vpop.f32.mrf.mxu3 }
 0x397   : > { %v1878_v27 = vadd.f32 %v1877_v6, %v1865_v31  ;;  %v1899_v15 = vmul.f32 0.125, %v1892_v7 }
 0x399   : > { %2390 = vtanh.f32 %v1878_v27  ;;  %v1901_v49 = vadd.f32 127.0, %v1899_v15 }
 0x39b   : > { %v1903_v57 = vmax.f32 %v1901_v49, 0.0 }
 0x39d   : > { %v1905_v55 = vmin.f32 %v1903_v57, 255.0 }
 0x39e   : > { %v1879_v36 = vpop.f32.mrf.mxu3 }
 0x39f   : > { %v2391_v30 = vpop.eup %2390  ;;  %v2331_v8 = vcvt.f32.s32 %v1905_v55  ;;  %v2334_v16 = vand.u32 2147483648, %v1905_v55  ;;  %v2329_v12 = vand.u32 2147483647, %v1905_v55 }
 0x3a0   : > { %v1884_v59 = vmul.f32 127.0, %v2391_v30 }
 0x3a1   : > { %v2332_v22 = vcvt.s32.f32 %v2331_v8  ;;  %vm2330_vm3 = vcmp.lt.f32.partialorder %v2329_v12, 8388608.0 }
 0x3a2   : > { %v2323_v50 = vcvt.f32.s32 %v1884_v59  ;;  %v2321_v60 = vand.u32 2147483647, %v1884_v59  ;;  %v2326_v34 = vand.u32 2147483648, %v1884_v59 }
 0x3a3   : > { %v2333_v42 = vand.u32 2147483647, %v2332_v22 }
 0x3a4   : > { %v2324_v19 = vcvt.s32.f32 %v2323_v50  ;;  %vm2322_vm2 = vcmp.lt.f32.partialorder %v2321_v60, 8388608.0 }
 0x3a5   : > { %v2335_v2 = vor.u32 %v2334_v16, %v2333_v42 }
 0x3a6   : > { %v2325_v48 = vand.u32 2147483647, %v2324_v19 }
 0x3a7   : > { %v2336_v63 = vsel %vm2330_vm3, %v2335_v2, %v1905_v55 }
 0x3a8   : > { %v2327_v4 = vor.u32 %v2326_v34, %v2325_v48  ;;  %v1909_v21 = vmul.f32 0.003921569, %v2336_v63 }
 0x3aa   : > { %v2328_v14 = vsel %vm2322_vm2, %v2327_v4, %v1884_v59 }
 0x3ab   : > { %v1893_v18 = vrot.slane %v2328_v14, 4 }
 0x3ad   : > { %v1894_v29 = vadd.f32 %v2328_v14, %v1893_v18 }
 0x3af   : > { %v1895_v40 = vrot.slane %v1894_v29, 2 }
 0x3b1   : > { %v1896_v1 = vadd.f32 %v1895_v40, %v1894_v29 }
 0x3b3   : > { %v1897_v37 = vrot.slane %v1896_v1, 1 }
 0x3b5   : > { %v1898_v9 = vadd.f32 %v1897_v37, %v1896_v1 }
 0x3b7   : > { %v1900_v17 = vmul.f32 0.125, %v1898_v9 }
 0x3b9   : > { %v1902_v20 = vadd.f32 127.0, %v1900_v17 }
 0x3bb   : > { %v1904_v61 = vmax.f32 %v1902_v20, 0.0 }
 0x3bd   : > { %v1906_v5 = vmin.f32 %v1904_v61, 255.0 }
 0x3bf   : > { %v2339_v52 = vcvt.f32.s32 %v1906_v5  ;;  %v2337_v32 = vand.u32 2147483647, %v1906_v5  ;;  %v2342_v24 = vand.u32 2147483648, %v1906_v5 }
 0x3c1   : > { %v2340_v26 = vcvt.s32.f32 %v2339_v52  ;;  %vm2338_vm4 = vcmp.lt.f32.partialorder %v2337_v32, 8388608.0 }
 0x3c3   : > { %v2341_v35 = vand.u32 2147483647, %v2340_v26 }
 0x3c5   : > { %v2343_v62 = vor.u32 %v2342_v24, %v2341_v35 }
 0x3c7   : > { %v2344_v28 = vsel %vm2338_vm4, %v2343_v62, %v1906_v5 }
 0x3c8   : > { %v1910_v53 = vmul.f32 0.003921569, %v2344_v28 }
 0x3ca   : > { %v1913_v0 = vrot.slane %v1910_v53, 7 }
 0x3cc   : > { %v1915_v43 = vsel %vm1914_vm5, %v1909_v21, %v1913_v0 }
 0x3cd   : > { %1921 = vst.msk [vmem:[%s324_s20] sm:$0x3] %vm1919_vm6, %v1915_v43 }
 0x3ce   : > { %2419 = shalt.err (!%p2416_p5)
}
 0x3cf   : > { %2345 = dma.vmem_to_hbm [thread:$0]  (%p2535_p6), %s1936_s21, 32, %s1938_s22, %s1923_s28  }
 0x3d0 PF: > { %s1949_s9 = sand.u32 1, %s2442_s24   ;;  %p2348_p7 = pnand %p2005_p9, %p2539_p8 }
 0x3d1   : > { %s1950_s17 = scalar_lea.sflag [#allocation4], %s1949_s9 }
 0x3d2   : > { %p2349_p10 = pneg %p2348_p7 }
 0x3d4   : > { %2437 = dma.done.wait (%p2349_p10), %s1950_s17, 32  }
 0x3d5   : > { %2439 = vsyncadd (%p2349_p10), %s1950_s17, 4294967264  ;;  %p17_p11 = scmp.ge.s32.totalorder %s2520_s30, 4   ;;  %s3533_s24 = smov %s2446_s25 }
 0x3d6   : > { %s3534_s25 = smov %s2450_s26  ;;  %s3535_s26 = smov %s2533_s10 }
 0x3d7   : > { %s3536_s27 = smov %s2520_s30  ;;  %19 = sbr.rel (!%p17_p11) target bundleno = 3 (0x3), region = 126 }
 0x3dc   :  { %1956 = vsyncpa [#allocation4], 1 }
 0x3dd   :  { %1958 = vsyncpa [#allocation4 + $0x1], 1 }

</bundles_post_ra>
